<compile_context>
chip_gen: v5e
topology: v5e:2x2
jax: 0.10.0
libtpu: 0.0.40
codegen_flags: <defaults>
</compile_context>

<pallas_src>
import jax
import jax.numpy as jnp
from jax import lax
from jax.experimental import pallas as pl
from jax.experimental.pallas import tpu as pltpu


def _silu(x):
    # exact sigmoid; EUP/VPU cost is hidden under MXU / overhead here
    return x * (1.0 / (1.0 + jnp.exp(-x)))


# --------------------------- fused GCL kernel --------------------------------
def _make_gcl_kernel(n_pad, inv_norm):
    def kernel(rows_ref, cols_ref, h_ref,
               w1s_ref, w1t_ref, b1_ref, w2_ref, b2_ref,
               w3h_ref, w3a_ref, b3_ref, w4_ref, b4_ref,
               mij_ref, hout_ref, acc_ref, hw_ref):
        i = pl.program_id(0)
        te = rows_ref.shape[1]

        # ---- step 0: zero the accumulator; hoist W1 through the gather -------
        @pl.when(i == 0)
        def _():
            acc_ref[...] = jnp.zeros_like(acc_ref)
            hf = h_ref[...].astype(jnp.float32)
            hw_ref[pl.ds(0, n_pad), :] = jnp.dot(
                hf, w1s_ref[...], preferred_element_type=jnp.float32)
            # b1 folded into the target half: pre = hW_src[r] + (hW_tgt + b1)[c]
            hw_ref[pl.ds(n_pad, n_pad), :] = (
                jnp.dot(hf, w1t_ref[...], preferred_element_type=jnp.float32)
                + b1_ref[...])

        # ---- one lane-dense stacked one-hot, reused for gather AND scatter ---
        # rows: sentinel == 2*n_pad (out of iota range -> padded edge dropped)
        # cols: already shifted by +n_pad in the wrapper, sentinel == 2*n_pad
        rl = rows_ref[...]                                     # (1, te) int32
        cs = cols_ref[...]                                     # (1, te) int32
        sub2 = lax.broadcasted_iota(jnp.int32, (2 * n_pad, te), 0)
        oh_cat = jnp.logical_or(sub2 == rl, sub2 == cs).astype(jnp.float32)

        # ---- gather + first edge-MLP linear fused: K = 2*n_pad, no transpose -
        pre = lax.dot_general(oh_cat, hw_ref[...],
                              (((0,), (0,)), ((), ())),
                              preferred_element_type=jnp.float32)   # (te, H)
        h1 = _silu(pre)
        mij = _silu(jnp.dot(h1, w2_ref[...], preferred_element_type=jnp.float32)
                    + b2_ref[...])
        # NOTE: padded-edge rows of mij are silu(b2) (non-zero) and are sliced
        # off in the wrapper; they never reach the accumulator (row one-hot = 0).
        mij_ref[...] = mij.astype(mij_ref.dtype)

        # ---- segment-sum scatter: reuse the row half of the same one-hot -----
        # (n_pad, te) @ (te, H): nodes on sublanes, edges on the contraction axis.
        acc_ref[...] += jnp.dot(oh_cat[:n_pad, :], mij,
                                preferred_element_type=jnp.float32)

        # ---- last step: node MLP + residual on the resident accumulator ------
        @pl.when(i == pl.num_programs(0) - 1)
        def _():
            agg = acc_ref[...] * inv_norm        # aggregation_method == 'sum'
            hh = h_ref[...].astype(jnp.float32)
            t = _silu(jnp.dot(hh, w3h_ref[...], preferred_element_type=jnp.float32)
                      + jnp.dot(agg, w3a_ref[...], preferred_element_type=jnp.float32)
                      + b3_ref[...])
            out = jnp.dot(t, w4_ref[...], preferred_element_type=jnp.float32) + b4_ref[...]
            hout_ref[...] = (hh + out).astype(hout_ref.dtype)

    return kernel


# ------------------------------- GCL forward ---------------------------------
def gcl_forward(h, edge_index, params, *, normalization_factor, tile_e=512):
    row, col = edge_index
    N, F = h.shape
    H = params["w2"].shape[0]
    E = row.shape[0]

    # ---- pad nodes to a multiple of 8 (sublane alignment of resident state) ----
    n_pad = max(8, ((N + 7) // 8) * 8)
    h_p = h if n_pad == N else jnp.zeros((n_pad, F), h.dtype).at[:N].set(h)

    # ---- edge tile: multiple of 128 (lane-dense (1, tile_e) index layout) ----
    tile_e = max(128, (int(tile_e) // 128) * 128)
    tile_e = min(tile_e, ((E + 127) // 128) * 128)

    # ---- VMEM budget guard (v7x: 64 MiB physical, 32 MiB scoped default) ----
    def _vmem_est(te):
        lane = lambda x: ((x + 127) // 128) * 128
        sub = lambda x: ((x + 7) // 8) * 8
        resident = 4 * (2 * n_pad * lane(F)          # h + h_out (VMEM-resident)
                        + n_pad * lane(H)            # acc scratch
                        + 2 * n_pad * lane(H)        # hoisted hW scratch
                        + 6 * sub(F) * lane(H)       # weights (generous)
                        + 4 * 8 * lane(H))           # biases (sublane padded)
        streamed = 2 * 4 * (te * lane(H)             # mij tile (double-buffered)
                            + 2 * 8 * te)            # two (1, te) index tiles
        return resident + streamed

    VMEM_BUDGET = 24 * 1024 * 1024                   # headroom under 32 MiB scoped
    while tile_e > 128 and _vmem_est(tile_e) > VMEM_BUDGET:
        tile_e -= 128
    assert _vmem_est(tile_e) <= VMEM_BUDGET, (
        "resident state too large for VMEM; switch to node tiling / DMA gather")

    e_pad = pl.cdiv(E, tile_e) * tile_e

    # sentinel 2*n_pad is outside the stacked-iota range -> padded edges dropped
    sentinel = jnp.int32(2 * n_pad)
    row_p = jnp.full((1, e_pad), sentinel, jnp.int32).at[0, :E].set(row.astype(jnp.int32))
    col_p = jnp.full((1, e_pad), sentinel, jnp.int32).at[0, :E].set(
        col.astype(jnp.int32) + n_pad)               # pre-shift into the tgt half

    # split W1 into source/target halves (the [src, tgt] concat disappears)
    w1s = params["w1"][:F]
    w1t = params["w1"][F:]

    kernel = _make_gcl_kernel(n_pad, float(1.0 / normalization_factor))
    grid = (e_pad // tile_e,)
    full = lambda a: pl.BlockSpec(a.shape, lambda i: (0,) * a.ndim)

    mij_pad, hout_pad = pl.pallas_call(
        kernel,
        out_shape=(
            jax.ShapeDtypeStruct((e_pad, H), h.dtype),   # mij
            jax.ShapeDtypeStruct((n_pad, F), h.dtype),   # h_out
        ),
        grid_spec=pltpu.PrefetchScalarGridSpec(
            num_scalar_prefetch=0,
            grid=grid,
            in_specs=[
                pl.BlockSpec((1, tile_e), lambda i: (0, i)),   # rows (lane-dense)
                pl.BlockSpec((1, tile_e), lambda i: (0, i)),   # cols+n_pad (lane-dense)
                full(h_p),                                     # h resident in VMEM
                full(w1s), full(w1t), full(params["b1"]),
                full(params["w2"]), full(params["b2"]),
                full(params["w3h"]), full(params["w3a"]), full(params["b3"]),
                full(params["w4"]), full(params["b4"]),
            ],
            out_specs=[
                pl.BlockSpec((tile_e, H), lambda i: (i, 0)),   # mij per edge tile
                pl.BlockSpec((n_pad, F), lambda i: (0, 0)),    # h_out (last step only)
            ],
            scratch_shapes=[
                pltpu.VMEM((n_pad, H), jnp.float32),       # agg accumulator
                pltpu.VMEM((2 * n_pad, H), jnp.float32),   # hoisted [h@W1s ; h@W1t+b1]
            ],
        ),
        compiler_params=pltpu.CompilerParams(
            # accumulator / h_out revisited across the edge axis -> arbitrary
            dimension_semantics=("arbitrary",),
            vmem_limit_bytes=32 * 1024 * 1024,
        ),
    )(row_p, col_p, h_p,
      w1s, w1t, params["b1"], params["w2"], params["b2"],
      params["w3h"], params["w3a"], params["b3"], params["w4"], params["b4"])

    return hout_pad[:N], mij_pad[:E]


# ----------------------------- pure-JAX reference ----------------------------
def gcl_reference(h, edge_index, params, *, normalization_factor):
    row, col = edge_index
    N = h.shape[0]
    ein = jnp.concatenate([h[row], h[col]], axis=1)
    m1 = _silu(ein @ params["w1"] + params["b1"])
    mij = _silu(m1 @ params["w2"] + params["b2"])
    agg = jax.ops.segment_sum(mij, row, num_segments=N) / normalization_factor
    t = _silu(h @ params["w3h"] + agg @ params["w3a"] + params["b3"])
    h_out = h + (t @ params["w4"] + params["b4"])
    return h_out, mij


# ----------------------------------- test ------------------------------------
def _make_params(key, NF, HF):
    keys = jax.random.split(key, 9)
    init_w = lambda k, shape: jax.random.normal(k, shape, dtype=jnp.float32) * 0.1
    return {
        # edge_mlp: Linear(2*NF -> HF), SiLU, Linear(HF -> HF), SiLU
        "w1": init_w(keys[0], (2 * NF, HF)),
        "b1": init_w(keys[1], (1, HF)),
        "w2": init_w(keys[2], (HF, HF)),
        "b2": init_w(keys[3], (1, HF)),
        # node_mlp: Linear(NF + HF -> HF) split into [h | agg] halves, SiLU, Linear(HF -> NF)
        "w3h": init_w(keys[4], (NF, HF)),
        "w3a": init_w(keys[5], (HF, HF)),
        "b3": init_w(keys[6], (1, HF)),
        "w4": init_w(keys[7], (HF, NF)),
        "b4": init_w(keys[8], (1, NF)),
    }


def _run_case(key, N, E, NF, HF, norm_factor, tile_e):
    k0, k1, k2, k3 = jax.random.split(key, 4)
    h = jax.random.normal(k0, (N, NF), dtype=jnp.float32)
    row = jax.random.randint(k1, (E,), 0, N, dtype=jnp.int32)
    col = jax.random.randint(k2, (E,), 0, N, dtype=jnp.int32)
    params = _make_params(k3, NF, HF)

    h_out, mij = gcl_forward(h, (row, col), params,
                             normalization_factor=norm_factor, tile_e=tile_e)
    jax.block_until_ready((h_out, mij))

    h_ref, mij_ref = gcl_reference(h, (row, col), params,
                                   normalization_factor=norm_factor)
    assert jnp.allclose(mij, mij_ref, atol=1e-4, rtol=1e-4), "mij mismatch"
    assert jnp.allclose(h_out, h_ref, atol=1e-4, rtol=1e-4), "h mismatch"


if __name__ == "__main__":
    NORM_FACTOR = 8.0
    key = jax.random.PRNGKey(0)
    k_a, k_b = jax.random.split(key)

    # primary (module-consistent small shapes): single grid step
    _run_case(k_a, N=32, E=128, NF=32, HF=32, norm_factor=NORM_FACTOR, tile_e=512)
    # secondary: exercises multi-step grid, edge padding and node padding
    _run_case(k_b, N=20, E=300, NF=32, HF=32, norm_factor=NORM_FACTOR, tile_e=128)

    print("KERNEL_OK")
</pallas_src>

<mosaic_0001>
module attributes {stable_mosaic.version = 11 : i64} {
  func.func @kernel(%arg0: i32, %arg1: memref<1x128xi32, #tpu.memory_space<vmem>>, %arg2: memref<1x128xi32, #tpu.memory_space<vmem>>, %arg3: memref<32x32xf32, #tpu.memory_space<vmem>>, %arg4: memref<32x32xf32, #tpu.memory_space<vmem>>, %arg5: memref<32x32xf32, #tpu.memory_space<vmem>>, %arg6: memref<1x32xf32, #tpu.memory_space<vmem>>, %arg7: memref<32x32xf32, #tpu.memory_space<vmem>>, %arg8: memref<1x32xf32, #tpu.memory_space<vmem>>, %arg9: memref<32x32xf32, #tpu.memory_space<vmem>>, %arg10: memref<32x32xf32, #tpu.memory_space<vmem>>, %arg11: memref<1x32xf32, #tpu.memory_space<vmem>>, %arg12: memref<32x32xf32, #tpu.memory_space<vmem>>, %arg13: memref<1x32xf32, #tpu.memory_space<vmem>>, %arg14: memref<128x32xf32, #tpu.memory_space<vmem>>, %arg15: memref<32x32xf32, #tpu.memory_space<vmem>>, %arg16: memref<32x32xf32, #tpu.memory_space<vmem>>, %arg17: memref<64x32xf32, #tpu.memory_space<vmem>>) attributes {dimension_semantics = [#tpu.dimension_semantics<arbitrary>], iteration_bounds = array<i64: 1>, scalar_prefetch = 0 : i64, scratch_operands = 2 : i64, tpu.core_type = #tpu.core_type<tc>, window_params = [{transform_indices = @transform_0, window_bounds = array<i64: 1, 128>}, {transform_indices = @transform_1, window_bounds = array<i64: 1, 128>}, {pipeline_mode = #tpu.pipeline_mode<synchronous>, transform_indices = @transform_2, window_bounds = array<i64: 32, 32>}, {pipeline_mode = #tpu.pipeline_mode<synchronous>, transform_indices = @transform_3, window_bounds = array<i64: 32, 32>}, {pipeline_mode = #tpu.pipeline_mode<synchronous>, transform_indices = @transform_4, window_bounds = array<i64: 32, 32>}, {pipeline_mode = #tpu.pipeline_mode<synchronous>, transform_indices = @transform_5, window_bounds = array<i64: 1, 32>}, {pipeline_mode = #tpu.pipeline_mode<synchronous>, transform_indices = @transform_6, window_bounds = array<i64: 32, 32>}, {pipeline_mode = #tpu.pipeline_mode<synchronous>, transform_indices = @transform_7, window_bounds = array<i64: 1, 32>}, {pipeline_mode = #tpu.pipeline_mode<synchronous>, transform_indices = @transform_8, window_bounds = array<i64: 32, 32>}, {pipeline_mode = #tpu.pipeline_mode<synchronous>, transform_indices = @transform_9, window_bounds = array<i64: 32, 32>}, {pipeline_mode = #tpu.pipeline_mode<synchronous>, transform_indices = @transform_10, window_bounds = array<i64: 1, 32>}, {pipeline_mode = #tpu.pipeline_mode<synchronous>, transform_indices = @transform_11, window_bounds = array<i64: 32, 32>}, {pipeline_mode = #tpu.pipeline_mode<synchronous>, transform_indices = @transform_12, window_bounds = array<i64: 1, 32>}, {transform_indices = @transform_13, window_bounds = array<i64: 128, 32>}, {pipeline_mode = #tpu.pipeline_mode<synchronous>, transform_indices = @transform_14, window_bounds = array<i64: 32, 32>}]} {
    %c0_i32 = arith.constant 0 : i32
    %0 = arith.cmpi eq, %arg0, %c0_i32 : i32
    %1 = arith.extui %0 : i1 to i32
    %c0_i32_0 = arith.constant 0 : i32
    %2 = arith.cmpi ne, %1, %c0_i32_0 : i32
    scf.if %2 {
      %cst_26 = arith.constant 0.000000e+00 : f32
      %45 = vector.broadcast %cst_26 : f32 to vector<32x32xf32>
      %c0_27 = arith.constant 0 : index
      %c0_28 = arith.constant 0 : index
      %46 = vector.load %arg16[%c0_27, %c0_28] : memref<32x32xf32, #tpu.memory_space<vmem>>, vector<32x32xf32>
      tpu.vector_store %arg16[%c0_27, %c0_28], %45 {strides = array<i32>} : memref<32x32xf32, #tpu.memory_space<vmem>>, vector<32x32xf32>,
      %c0_29 = arith.constant 0 : index
      %c0_30 = arith.constant 0 : index
      %47 = vector.load %arg3[%c0_29, %c0_30] : memref<32x32xf32, #tpu.memory_space<vmem>>, vector<32x32xf32>
      %c0_31 = arith.constant 0 : index
      %c0_32 = arith.constant 0 : index
      %48 = vector.load %arg4[%c0_31, %c0_32] : memref<32x32xf32, #tpu.memory_space<vmem>>, vector<32x32xf32>
      %cst_33 = arith.constant dense<0.000000e+00> : vector<32x32xf32>
      %49 = tpu.matmul %47, %48, %cst_33 {dimension_numbers = #tpu.dot_dimension_numbers<[1], [0], [0], [1], [0, 0, 1, 1], [], []>} : vector<32x32xf32>, vector<32x32xf32>, vector<32x32xf32> -> vector<32x32xf32>
      %c0_34 = arith.constant 0 : index
      %c0_35 = arith.constant 0 : index
      %50 = vector.load %arg17[%c0_34, %c0_35] : memref<64x32xf32, #tpu.memory_space<vmem>>, vector<32x32xf32>
      tpu.vector_store %arg17[%c0_34, %c0_35], %49 {strides = array<i32>} : memref<64x32xf32, #tpu.memory_space<vmem>>, vector<32x32xf32>,
      %c0_36 = arith.constant 0 : index
      %c0_37 = arith.constant 0 : index
      %51 = vector.load %arg5[%c0_36, %c0_37] : memref<32x32xf32, #tpu.memory_space<vmem>>, vector<32x32xf32>
      %cst_38 = arith.constant dense<0.000000e+00> : vector<32x32xf32>
      %52 = tpu.matmul %47, %51, %cst_38 {dimension_numbers = #tpu.dot_dimension_numbers<[1], [0], [0], [1], [0, 0, 1, 1], [], []>} : vector<32x32xf32>, vector<32x32xf32>, vector<32x32xf32> -> vector<32x32xf32>
      %c0_39 = arith.constant 0 : index
      %c0_40 = arith.constant 0 : index
      %53 = vector.load %arg6[%c0_39, %c0_40] : memref<1x32xf32, #tpu.memory_space<vmem>>, vector<1x32xf32>
      %54 = vector.broadcast %53 : vector<1x32xf32> to vector<32x32xf32>
      %55 = arith.addf %52, %54 : vector<32x32xf32>
      %c32 = arith.constant 32 : index
      %c0_41 = arith.constant 0 : index
      %56 = vector.load %arg17[%c32, %c0_41] : memref<64x32xf32, #tpu.memory_space<vmem>>, vector<32x32xf32>
      tpu.vector_store %arg17[%c32, %c0_41], %55 {strides = array<i32>} : memref<64x32xf32, #tpu.memory_space<vmem>>, vector<32x32xf32>,
    } else {
    }
    %c0 = arith.constant 0 : index
    %c0_1 = arith.constant 0 : index
    %3 = vector.load %arg1[%c0, %c0_1] : memref<1x128xi32, #tpu.memory_space<vmem>>, vector<1x128xi32>
    %c0_2 = arith.constant 0 : index
    %c0_3 = arith.constant 0 : index
    %4 = vector.load %arg2[%c0_2, %c0_3] : memref<1x128xi32, #tpu.memory_space<vmem>>, vector<1x128xi32>
    %5 = tpu.iota {dimensions = array<i32: 0>} : vector<64x128xi32>
    %6 = vector.broadcast %3 : vector<1x128xi32> to vector<64x128xi32>
    %7 = arith.cmpi eq, %5, %6 : vector<64x128xi32>
    %8 = vector.broadcast %4 : vector<1x128xi32> to vector<64x128xi32>
    %9 = arith.cmpi eq, %5, %8 : vector<64x128xi32>
    %10 = arith.ori %7, %9 : vector<64x128xi1>
    %11 = arith.extui %10 : vector<64x128xi1> to vector<64x128xi32>
    %12 = arith.sitofp %11 : vector<64x128xi32> to vector<64x128xf32>
    %c0_4 = arith.constant 0 : index
    %c0_5 = arith.constant 0 : index
    %13 = vector.load %arg17[%c0_4, %c0_5] : memref<64x32xf32, #tpu.memory_space<vmem>>, vector<64x32xf32>
    %cst = arith.constant dense<0.000000e+00> : vector<128x32xf32>
    %14 = tpu.matmul %12, %13, %cst {dimension_numbers = #tpu.dot_dimension_numbers<[0], [0], [1], [1], [0, 1, 1, 1], [], []>} : vector<64x128xf32>, vector<64x32xf32>, vector<128x32xf32> -> vector<128x32xf32>
    %cst_6 = arith.constant 0.000000e+00 : f32
    %15 = vector.broadcast %cst_6 : f32 to vector<128x32xf32>
    %16 = arith.subf %15, %14 : vector<128x32xf32>
    %17 = math.exp %16 : vector<128x32xf32>
    %cst_7 = arith.constant 1.000000e+00 : f32
    %18 = vector.broadcast %cst_7 : f32 to vector<128x32xf32>
    %19 = arith.addf %18, %17 : vector<128x32xf32>
    %cst_8 = arith.constant 1.000000e+00 : f32
    %20 = vector.broadcast %cst_8 : f32 to vector<128x32xf32>
    %21 = arith.divf %20, %19 : vector<128x32xf32>
    %22 = arith.mulf %14, %21 : vector<128x32xf32>
    %c0_9 = arith.constant 0 : index
    %c0_10 = arith.constant 0 : index
    %23 = vector.load %arg7[%c0_9, %c0_10] : memref<32x32xf32, #tpu.memory_space<vmem>>, vector<32x32xf32>
    %cst_11 = arith.constant dense<0.000000e+00> : vector<128x32xf32>
    %24 = tpu.matmul %22, %23, %cst_11 {dimension_numbers = #tpu.dot_dimension_numbers<[1], [0], [0], [1], [0, 0, 1, 1], [], []>} : vector<128x32xf32>, vector<32x32xf32>, vector<128x32xf32> -> vector<128x32xf32>
    %c0_12 = arith.constant 0 : index
    %c0_13 = arith.constant 0 : index
    %25 = vector.load %arg8[%c0_12, %c0_13] : memref<1x32xf32, #tpu.memory_space<vmem>>, vector<1x32xf32>
    %26 = vector.broadcast %25 : vector<1x32xf32> to vector<128x32xf32>
    %27 = arith.addf %24, %26 : vector<128x32xf32>
    %cst_14 = arith.constant 0.000000e+00 : f32
    %28 = vector.broadcast %cst_14 : f32 to vector<128x32xf32>
    %29 = arith.subf %28, %27 : vector<128x32xf32>
    %30 = math.exp %29 : vector<128x32xf32>
    %cst_15 = arith.constant 1.000000e+00 : f32
    %31 = vector.broadcast %cst_15 : f32 to vector<128x32xf32>
    %32 = arith.addf %31, %30 : vector<128x32xf32>
    %cst_16 = arith.constant 1.000000e+00 : f32
    %33 = vector.broadcast %cst_16 : f32 to vector<128x32xf32>
    %34 = arith.divf %33, %32 : vector<128x32xf32>
    %35 = arith.mulf %27, %34 : vector<128x32xf32>
    %c0_17 = arith.constant 0 : index
    %c0_18 = arith.constant 0 : index
    %36 = vector.load %arg14[%c0_17, %c0_18] : memref<128x32xf32, #tpu.memory_space<vmem>>, vector<128x32xf32>
    tpu.vector_store %arg14[%c0_17, %c0_18], %35 {strides = array<i32>} : memref<128x32xf32, #tpu.memory_space<vmem>>, vector<128x32xf32>,
    %c0_19 = arith.constant 0 : index
    %c0_20 = arith.constant 0 : index
    %37 = vector.load %arg16[%c0_19, %c0_20] : memref<32x32xf32, #tpu.memory_space<vmem>>, vector<32x32xf32>
    %38 = vector.extract_strided_slice %12 {offsets = [0, 0], sizes = [32, 128], strides = [1, 1]} : vector<64x128xf32> to vector<32x128xf32>
    %cst_21 = arith.constant dense<0.000000e+00> : vector<32x32xf32>
    %39 = tpu.matmul %38, %35, %cst_21 {dimension_numbers = #tpu.dot_dimension_numbers<[1], [0], [0], [1], [0, 0, 1, 1], [], []>} : vector<32x128xf32>, vector<128x32xf32>, vector<32x32xf32> -> vector<32x32xf32>
    %40 = arith.addf %37, %39 : vector<32x32xf32>
    %c0_22 = arith.constant 0 : index
    %c0_23 = arith.constant 0 : index
    %41 = vector.load %arg16[%c0_22, %c0_23] : memref<32x32xf32, #tpu.memory_space<vmem>>, vector<32x32xf32>
    tpu.vector_store %arg16[%c0_22, %c0_23], %40 {strides = array<i32>} : memref<32x32xf32, #tpu.memory_space<vmem>>, vector<32x32xf32>,
    %c0_i32_24 = arith.constant 0 : i32
    %42 = arith.cmpi eq, %arg0, %c0_i32_24 : i32
    %43 = arith.extui %42 : i1 to i32
    %c0_i32_25 = arith.constant 0 : i32
    %44 = arith.cmpi ne, %43, %c0_i32_25 : i32
    scf.if %44 {
      %c0_26 = arith.constant 0 : index
      %c0_27 = arith.constant 0 : index
      %45 = vector.load %arg16[%c0_26, %c0_27] : memref<32x32xf32, #tpu.memory_space<vmem>>, vector<32x32xf32>
      %cst_28 = arith.constant 1.250000e-01 : f32
      %46 = vector.broadcast %cst_28 : f32 to vector<32x32xf32>
      %47 = arith.mulf %45, %46 : vector<32x32xf32>
      %c0_29 = arith.constant 0 : index
      %c0_30 = arith.constant 0 : index
      %48 = vector.load %arg3[%c0_29, %c0_30] : memref<32x32xf32, #tpu.memory_space<vmem>>, vector<32x32xf32>
      %c0_31 = arith.constant 0 : index
      %c0_32 = arith.constant 0 : index
      %49 = vector.load %arg9[%c0_31, %c0_32] : memref<32x32xf32, #tpu.memory_space<vmem>>, vector<32x32xf32>
      %cst_33 = arith.constant dense<0.000000e+00> : vector<32x32xf32>
      %50 = tpu.matmul %48, %49, %cst_33 {dimension_numbers = #tpu.dot_dimension_numbers<[1], [0], [0], [1], [0, 0, 1, 1], [], []>} : vector<32x32xf32>, vector<32x32xf32>, vector<32x32xf32> -> vector<32x32xf32>
      %c0_34 = arith.constant 0 : index
      %c0_35 = arith.constant 0 : index
      %51 = vector.load %arg10[%c0_34, %c0_35] : memref<32x32xf32, #tpu.memory_space<vmem>>, vector<32x32xf32>
      %cst_36 = arith.constant dense<0.000000e+00> : vector<32x32xf32>
      %52 = tpu.matmul %47, %51, %cst_36 {dimension_numbers = #tpu.dot_dimension_numbers<[1], [0], [0], [1], [0, 0, 1, 1], [], []>} : vector<32x32xf32>, vector<32x32xf32>, vector<32x32xf32> -> vector<32x32xf32>
      %53 = arith.addf %50, %52 : vector<32x32xf32>
      %c0_37 = arith.constant 0 : index
      %c0_38 = arith.constant 0 : index
      %54 = vector.load %arg11[%c0_37, %c0_38] : memref<1x32xf32, #tpu.memory_space<vmem>>, vector<1x32xf32>
      %55 = vector.broadcast %54 : vector<1x32xf32> to vector<32x32xf32>
      %56 = arith.addf %53, %55 : vector<32x32xf32>
      %cst_39 = arith.constant 0.000000e+00 : f32
      %57 = vector.broadcast %cst_39 : f32 to vector<32x32xf32>
      %58 = arith.subf %57, %56 : vector<32x32xf32>
      %59 = math.exp %58 : vector<32x32xf32>
      %cst_40 = arith.constant 1.000000e+00 : f32
      %60 = vector.broadcast %cst_40 : f32 to vector<32x32xf32>
      %61 = arith.addf %60, %59 : vector<32x32xf32>
      %cst_41 = arith.constant 1.000000e+00 : f32
      %62 = vector.broadcast %cst_41 : f32 to vector<32x32xf32>
      %63 = arith.divf %62, %61 : vector<32x32xf32>
      %64 = arith.mulf %56, %63 : vector<32x32xf32>
      %c0_42 = arith.constant 0 : index
      %c0_43 = arith.constant 0 : index
      %65 = vector.load %arg12[%c0_42, %c0_43] : memref<32x32xf32, #tpu.memory_space<vmem>>, vector<32x32xf32>
      %cst_44 = arith.constant dense<0.000000e+00> : vector<32x32xf32>
      %66 = tpu.matmul %64, %65, %cst_44 {dimension_numbers = #tpu.dot_dimension_numbers<[1], [0], [0], [1], [0, 0, 1, 1], [], []>} : vector<32x32xf32>, vector<32x32xf32>, vector<32x32xf32> -> vector<32x32xf32>
      %c0_45 = arith.constant 0 : index
      %c0_46 = arith.constant 0 : index
      %67 = vector.load %arg13[%c0_45, %c0_46] : memref<1x32xf32, #tpu.memory_space<vmem>>, vector<1x32xf32>
      %68 = vector.broadcast %67 : vector<1x32xf32> to vector<32x32xf32>
      %69 = arith.addf %66, %68 : vector<32x32xf32>
      %70 = arith.addf %48, %69 : vector<32x32xf32>
      %c0_47 = arith.constant 0 : index
      %c0_48 = arith.constant 0 : index
      %71 = vector.load %arg15[%c0_47, %c0_48] : memref<32x32xf32, #tpu.memory_space<vmem>>, vector<32x32xf32>
      tpu.vector_store %arg15[%c0_47, %c0_48], %70 {strides = array<i32>} : memref<32x32xf32, #tpu.memory_space<vmem>>, vector<32x32xf32>,
    } else {
    }
    return
  }
  func.func @transform_0(%arg0: i32) -> (i32, i32) {
    %c0_i32 = arith.constant 0 : i32
    %c0_i32_0 = arith.constant 0 : i32
    return %c0_i32, %arg0 : i32, i32
  }
  func.func @transform_1(%arg0: i32) -> (i32, i32) {
    %c0_i32 = arith.constant 0 : i32
    %c0_i32_0 = arith.constant 0 : i32
    return %c0_i32, %arg0 : i32, i32
  }
  func.func @transform_2(%arg0: i32) -> (i32, i32) {
    %c0_i32 = arith.constant 0 : i32
    %c0_i32_0 = arith.constant 0 : i32
    %c0_i32_1 = arith.constant 0 : i32
    return %c0_i32, %c0_i32_0 : i32, i32
  }
  func.func @transform_3(%arg0: i32) -> (i32, i32) {
    %c0_i32 = arith.constant 0 : i32
    %c0_i32_0 = arith.constant 0 : i32
    %c0_i32_1 = arith.constant 0 : i32
    return %c0_i32, %c0_i32_0 : i32, i32
  }
  func.func @transform_4(%arg0: i32) -> (i32, i32) {
    %c0_i32 = arith.constant 0 : i32
    %c0_i32_0 = arith.constant 0 : i32
    %c0_i32_1 = arith.constant 0 : i32
    return %c0_i32, %c0_i32_0 : i32, i32
  }
  func.func @transform_5(%arg0: i32) -> (i32, i32) {
    %c0_i32 = arith.constant 0 : i32
    %c0_i32_0 = arith.constant 0 : i32
    %c0_i32_1 = arith.constant 0 : i32
    return %c0_i32, %c0_i32_0 : i32, i32
  }
  func.func @transform_6(%arg0: i32) -> (i32, i32) {
    %c0_i32 = arith.constant 0 : i32
    %c0_i32_0 = arith.constant 0 : i32
    %c0_i32_1 = arith.constant 0 : i32
    return %c0_i32, %c0_i32_0 : i32, i32
  }
  func.func @transform_7(%arg0: i32) -> (i32, i32) {
    %c0_i32 = arith.constant 0 : i32
    %c0_i32_0 = arith.constant 0 : i32
    %c0_i32_1 = arith.constant 0 : i32
    return %c0_i32, %c0_i32_0 : i32, i32
  }
  func.func @transform_8(%arg0: i32) -> (i32, i32) {
    %c0_i32 = arith.constant 0 : i32
    %c0_i32_0 = arith.constant 0 : i32
    %c0_i32_1 = arith.constant 0 : i32
    return %c0_i32, %c0_i32_0 : i32, i32
  }
  func.func @transform_9(%arg0: i32) -> (i32, i32) {
    %c0_i32 = arith.constant 0 : i32
    %c0_i32_0 = arith.constant 0 : i32
    %c0_i32_1 = arith.constant 0 : i32
    return %c0_i32, %c0_i32_0 : i32, i32
  }
  func.func @transform_10(%arg0: i32) -> (i32, i32) {
    %c0_i32 = arith.constant 0 : i32
    %c0_i32_0 = arith.constant 0 : i32
    %c0_i32_1 = arith.constant 0 : i32
    return %c0_i32, %c0_i32_0 : i32, i32
  }
  func.func @transform_11(%arg0: i32) -> (i32, i32) {
    %c0_i32 = arith.constant 0 : i32
    %c0_i32_0 = arith.constant 0 : i32
    %c0_i32_1 = arith.constant 0 : i32
    return %c0_i32, %c0_i32_0 : i32, i32
  }
  func.func @transform_12(%arg0: i32) -> (i32, i32) {
    %c0_i32 = arith.constant 0 : i32
    %c0_i32_0 = arith.constant 0 : i32
    %c0_i32_1 = arith.constant 0 : i32
    return %c0_i32, %c0_i32_0 : i32, i32
  }
  func.func @transform_13(%arg0: i32) -> (i32, i32) {
    %c0_i32 = arith.constant 0 : i32
    %c0_i32_0 = arith.constant 0 : i32
    return %arg0, %c0_i32 : i32, i32
  }
  func.func @transform_14(%arg0: i32) -> (i32, i32) {
    %c0_i32 = arith.constant 0 : i32
    %c0_i32_0 = arith.constant 0 : i32
    %c0_i32_1 = arith.constant 0 : i32
    return %c0_i32, %c0_i32_0 : i32, i32
  }
}

</mosaic_0001>

<bundles_post_ra>
// kernel: tpu_custom_call.1
= control target key start
LH: loop header
LB: loop body
LE: loop exit
PB: predicated region body
PF: predicated region fallthrough
CT: control target
= control target key end

     0   :  { %20 = vsyncpa [#allocation5], 0  ;;  %s2614_s0 = inlined_call_operand.hbm [shape: s32[1,128], index: 0, kind: input, shape index: {}]   ;;  %s2615_s1 = inlined_call_operand.hbm [shape: s32[1,128], index: 1, kind: input, shape index: {}]   ;;  %s2616_s2 = inlined_call_operand.hbm [shape: f32[32,32], index: 2, kind: input, shape index: {}]   ;;  %s2617_s3 = inlined_call_operand.hbm [shape: f32[32,32], index: 3, kind: input, shape index: {}]   ;;  %s2618_s4 = inlined_call_operand.hbm [shape: f32[32,32], index: 4, kind: input, shape index: {}]   ;;  %s2619_s5 = inlined_call_operand.vmem [shape: f32[1,32], index: 5, kind: input, shape index: {}]   ;;  %s2620_s6 = inlined_call_operand.hbm [shape: f32[32,32], index: 6, kind: input, shape index: {}]   ;;  %s2621_s7 = inlined_call_operand.vmem [shape: f32[1,32], index: 7, kind: input, shape index: {}]   ;;  %s2622_s8 = inlined_call_operand.hbm [shape: f32[32,32], index: 8, kind: input, shape index: {}]   ;;  %s2623_s9 = inlined_call_operand.hbm [shape: f32[32,32], index: 9, kind: input, shape index: {}]   ;;  %s2624_s10 = inlined_call_operand.vmem [shape: f32[1,32], index: 10, kind: input, shape index: {}]   ;;  %s2625_s11 = inlined_call_operand.hbm [shape: f32[32,32], index: 11, kind: input, shape index: {}]   ;;  %s2626_s12 = inlined_call_operand.vmem [shape: f32[1,32], index: 12, kind: input, shape index: {}]   ;;  %s2627_s13 = inlined_call_operand.vmem [shape: f32[128,32], index: 13, kind: output, shape index: {0}]   ;;  %s2628_s14 = inlined_call_operand.hbm [shape: f32[32,32], index: 14, kind: output, shape index: {1}]  }
   0x1   :  { %21 = vsyncpa [#allocation8], 0 }
   0x2   :  { %22 = vsyncpa [#allocation11], 0 }
   0x3   :  { %23 = vsyncpa [#allocation14], 0 }
   0x4   :  { %24 = vsyncpa [#allocation17], 0  ;;  %s42_s15 = sshll.u32 %s2615_s1, 4  ;;  %s43_s15 = int_to_ptr.hbm [resolvable:$true] %s42_s15 }
   0x5   :  { %25 = vsyncpa [#allocation6], 0  ;;  %s2069_s16 = smov [#allocation7]   ;;  %s65_s20 = sshll.u32 %s2617_s3, 4  ;;  %s66_s20 = int_to_ptr.hbm [resolvable:$true] %s65_s20 }
   0x6   :  { %s44_s17 = sshll.u32 %s2069_s16, 4  ;;  %s2070_s21 = smov [#allocation10]   ;;  %s45_s17 = int_to_ptr.vmem [resolvable:$true] %s44_s17 }
   0x7   :  { %47 = dma.hbm_to_vmem [thread:$0]  %s43_s15, 16, %s45_s17, [#allocation8]  }
   0x8   :  { %s67_s22 = sshll.u32 %s2070_s21, 4  ;;  %s93_s25 = sshll.u32 %s2620_s6, 4  ;;  %s68_s22 = int_to_ptr.vmem [resolvable:$true] %s67_s22  ;;  %s94_s25 = int_to_ptr.hbm [resolvable:$true] %s93_s25 }
   0x9   :  { %s2071_s1 = smov 128   ;;  %s2072_s26 = smov 8  }
   0xa   :  { %73 = dma.hbm_to_vmem [thread:$0]  %s66_s20, 512, %s68_s22, [#allocation11], %s2071_s1, %s2071_s1, %s2072_s26  }
   0xb   :  { %s121_s29 = sshll.u32 %s2623_s9, 4  ;;  %s2073_s3 = smov [#allocation13]   ;;  %s122_s29 = int_to_ptr.hbm [resolvable:$true] %s121_s29 }
   0xc   :  { %s95_s30 = sshll.u32 %s2073_s3, 4  ;;  %s2074_s6 = smov [#allocation16]   ;;  %s96_s30 = int_to_ptr.vmem [resolvable:$true] %s95_s30 }
   0xd   :  { %101 = dma.hbm_to_vmem [thread:$0]  %s94_s25, 512, %s96_s30, [#allocation14], %s2071_s1, %s2071_s1, %s2072_s26  }
   0xe   :  { %s123_s15 = sshll.u32 %s2074_s6, 4  ;;  %s31_s18 = sshll.u32 %s2614_s0, 4  ;;  %s124_s15 = int_to_ptr.vmem [resolvable:$true] %s123_s15  ;;  %s32_s18 = int_to_ptr.hbm [resolvable:$true] %s31_s18 }
   0xf   :  { %129 = dma.hbm_to_vmem [thread:$0]  %s122_s29, 512, %s124_s15, [#allocation17], %s2071_s1, %s2071_s1, %s2072_s26  }
  0x10   :  { %s52_s20 = sshll.u32 %s2616_s2, 4  ;;  %s2075_s21 = smov [#allocation4]   ;;  %s53_s20 = int_to_ptr.hbm [resolvable:$true] %s52_s20 }
  0x11   :  { %s33_s22 = sshll.u32 %s2075_s21, 4  ;;  %s2076_s23 = smov [#allocation9]   ;;  %s34_s22 = int_to_ptr.vmem [resolvable:$true] %s33_s22 }
  0x12   :  { %36 = dma.hbm_to_vmem [thread:$0]  %s32_s18, 16, %s34_s22, [#allocation5]  }
  0x13   :  { %s54_s24 = sshll.u32 %s2076_s23, 4  ;;  %s78_s0 = sshll.u32 %s2618_s4, 4  ;;  %s55_s24 = int_to_ptr.vmem [resolvable:$true] %s54_s24  ;;  %s79_s0 = int_to_ptr.hbm [resolvable:$true] %s78_s0 }
  0x14   :  { %60 = dma.hbm_to_vmem [thread:$0]  %s53_s20, 512, %s55_s24, [#allocation8], %s2071_s1, %s2071_s1, %s2072_s26  }
  0x15   :  { %s108_s2 = sshll.u32 %s2622_s8, 4  ;;  %s2077_s3 = smov [#allocation12]   ;;  %s109_s2 = int_to_ptr.hbm [resolvable:$true] %s108_s2 }
  0x16   :  { %s80_s30 = sshll.u32 %s2077_s3, 4  ;;  %s2078_s6 = smov [#allocation15]   ;;  %s81_s30 = int_to_ptr.vmem [resolvable:$true] %s80_s30 }
  0x17   :  { %86 = dma.hbm_to_vmem [thread:$0]  %s79_s0, 512, %s81_s30, [#allocation11], %s2071_s1, %s2071_s1, %s2072_s26  }
  0x18   :  { %s110_s4 = sshll.u32 %s2078_s6, 4  ;;  %s136_s17 = sshll.u32 %s2625_s11, 4  ;;  %s111_s4 = int_to_ptr.vmem [resolvable:$true] %s110_s4  ;;  %s137_s17 = int_to_ptr.hbm [resolvable:$true] %s136_s17 }
  0x19   :  { %116 = dma.hbm_to_vmem [thread:$0]  %s109_s2, 512, %s111_s4, [#allocation14], %s2071_s1, %s2071_s1, %s2072_s26  }
  0x1a   :  { %s2079_s8 = smov [#allocation18]  }
  0x1b   :  { %s138_s18 = sshll.u32 %s2079_s8, 4  ;;  %s139_s18 = int_to_ptr.vmem [resolvable:$true] %s138_s18 }
  0x1c   :  { %144 = dma.hbm_to_vmem [thread:$0]  %s137_s17, 512, %s139_s18, [#allocation17], %s2071_s1, %s2071_s1, %s2072_s26  }
  0x1d   :  { %2057 = dma.done.wait [#allocation5], 16  }
  0x1e   :  { %2058 = vsyncadd [#allocation5], 4294967280 }
  0x1f   :  { %2059 = dma.done.wait [#allocation8], 528  }
  0x20   :  { %2060 = vsyncadd [#allocation8], 4294966768 }
  0x21   :  { %2061 = dma.done.wait [#allocation11], 1024  }
  0x22   :  { %2062 = vsyncadd [#allocation11], 4294966272 }
  0x23   :  { %2063 = dma.done.wait [#allocation14], 1024  }
  0x24   :  { %2064 = vsyncadd [#allocation14], 4294966272 }
  0x25   :  { %2065 = dma.done.wait [#allocation17], 1024  }
  0x26   :  { %2066 = vsyncadd [#allocation17], 4294966272  ;;  %vm187_vm0 = vcmask 261120   ;;  %v2080_v0 = vmov 0.0   ;;  %v288_v1 = vlaneseq  ;;  %v248_v2 = vld [vmem:[#allocation12 + $0x18] sm:$0xff]  ;;  %v247_v3 = vld [vmem:[#allocation12 + $0x10] sm:$0xff] }
  0x27   :  { %188 = vst.msk [vmem:[#allocation2] sm:$0xff] %vm187_vm0, %v2080_v0  ;;  %265 = vmatpush.msra.mxu1 %v248_v2  ;;  %v199_v4 = vld [vmem:[#allocation10 + $0x18] sm:$0xff]  ;;  %v246_v5 = vld [vmem:[#allocation12 + $0x8] sm:$0xff]  ;;  %v245_v6 = vld [vmem:[#allocation12] sm:$0xff]  ;;  %s1570_s3 = sshll.u32 %s2628_s14, 4  ;;  %s1571_s3 = int_to_ptr.hbm [resolvable:$true] %s1570_s3 }
  0x28   :  { %189 = vst.msk [vmem:[#allocation2 + $0x8] sm:$0xff] %vm187_vm0, %v2080_v0  ;;  %224 = vmatpush.msra.mxu0 %v199_v4  ;;  %v198_v7 = vld [vmem:[#allocation10 + $0x10] sm:$0xff]  ;;  %v289_v8 = vshrl.u32 %v288_v1, 7  ;;  %v197_v9 = vld [vmem:[#allocation10 + $0x8] sm:$0xff]  ;;  %v192_v10 = vld [vmem:[#allocation9] sm:$0xff] }
  0x29   :  { %190 = vst.msk [vmem:[#allocation2 + $0x10] sm:$0xff] %vm187_vm0, %v2080_v0  ;;  %266 = vmatpush.msra.mxu1 %v247_v3  ;;  %v1667_v11 = vld [vmem:[#allocation4] ss:$0 sm:$0xff]  ;;  %v1668_v12 = vld [vmem:[#allocation7] ss:$0 sm:$0xff]  ;;  %v196_v14 = vld [vmem:[#allocation10] sm:$0xff] }
  0x2a   :  { %191 = vst.msk [vmem:[#allocation2 + $0x18] sm:$0xff] %vm187_vm0, %v2080_v0  ;;  %225 = vmatpush.msra.mxu0 %v198_v7  ;;  %v290_v13 = vadd.s32 8, %v289_v8  ;;  %vm298_vm1 = vcmp.eq.s32.totalorder %v289_v8, %v1667_v11  ;;  %vm307_vm2 = vcmp.eq.s32.totalorder %v289_v8, %v1668_v12  ;;  %v291_v18 = vadd.s32 16, %v289_v8  ;;  %v193_v19 = vld [vmem:[#allocation9 + $0x8] sm:$0xff]  ;;  %v194_v23 = vld [vmem:[#allocation9 + $0x10] sm:$0xff]  ;;  %v195_v27 = vld [vmem:[#allocation9 + $0x18] sm:$0xff] }
  0x2b   :  { %267 = vmatpush.msra.mxu1 %v246_v5  ;;  %vm2214_vm3 = vmor %vm298_vm1, %vm307_vm2  ;;  %v292_v22 = vadd.s32 24, %v289_v8  ;;  %v293_v26 = vadd.s32 32, %v289_v8  ;;  %v294_v29 = vadd.s32 40, %v289_v8  ;;  %v295_v31 = vadd.s32 48, %v289_v8  ;;  %v1669_v36 = vld [vmem:[%s2619_s5] ss:$0 sm:$0xff] }
  0x2c   :  { %226 = vmatpush.msra.mxu0 %v197_v9  ;;  %v1597_v16 = vsel %vm2214_vm3, 1.0, %v2080_v0  ;;  %vm299_vm4 = vcmp.eq.s32.totalorder %v290_v13, %v1667_v11  ;;  %vm308_vm5 = vcmp.eq.s32.totalorder %v290_v13, %v1668_v12  ;;  %vm300_vm7 = vcmp.eq.s32.totalorder %v291_v18, %v1667_v11  ;;  %v816_v9 = vld [vmem:[#allocation13 + $0x18] sm:$0xff]  ;;  %v813_v13 = vld [vmem:[#allocation13] sm:$0xff]  ;;  %v2562_v17 = vld [vmem:[#allocation9 + $0x10] sm:$0xff] }
  0x2d   :  { %268 = vmatpush.msra.mxu1 %v245_v6  ;;  %347 = vxpose.xlu0.b32.start [1/8] (short) %v1597_v16, 128  ;;  %vm2223_vm6 = vmor %vm299_vm4, %vm308_vm5  ;;  %vm309_vm8 = vcmp.eq.s32.totalorder %v291_v18, %v1668_v12  ;;  %vm301_vm10 = vcmp.eq.s32.totalorder %v292_v22, %v1667_v11  ;;  %vm310_vm11 = vcmp.eq.s32.totalorder %v292_v22, %v1668_v12  ;;  %v296_v33 = vadd.s32 56, %v289_v8  ;;  %v2554_v15 = vld [vmem:[#allocation9] sm:$0xff] }
  0x2e   :  { %1593 = vmatmul.msk.f32.vlgmr.msra.gmra.mxu1 %vm187_vm0, %v192_v10  ;;  %227 = vmatpush.msra.mxu0 %v196_v14  ;;  %v1598_v20 = vsel %vm2223_vm6, 1.0, %v2080_v0  ;;  %vm2232_vm9 = vmor %vm300_vm7, %vm309_vm8  ;;  %vm302_vm13 = vcmp.eq.s32.totalorder %v293_v26, %v1667_v11  ;;  %vm311_vm14 = vcmp.eq.s32.totalorder %v293_v26, %v1668_v12  ;;  %vm303_vm1 = vcmp.eq.s32.totalorder %v294_v29, %v1667_v11  ;;  %v1271_v21 = vld [vmem:[#allocation2] sm:$0xff] }
  0x2f   :  { %1589 = vmatmul.msk.f32.vlgmr.msra.gmra.mxu0 %vm187_vm0, %v192_v10  ;;  %v1599_v24 = vsel %vm2232_vm9, 1.0, %v2080_v0  ;;  %vm2241_vm12 = vmor %vm301_vm10, %vm310_vm11  ;;  %vm312_vm2 = vcmp.eq.s32.totalorder %v294_v29, %v1668_v12  ;;  %vm304_vm5 = vcmp.eq.s32.totalorder %v295_v31, %v1667_v11  ;;  %vm313_vm7 = vcmp.eq.s32.totalorder %v295_v31, %v1668_v12  ;;  %882 = vmatpush.msra.mxu3 %v816_v9  ;;  %v815_v10 = vld [vmem:[#allocation13 + $0x10] sm:$0xff] }
  0x30   :  { %v1600_v28 = vsel %vm2241_vm12, 1.0, %v2080_v0  ;;  %vm319_vm15 = vmor %vm302_vm13, %vm311_vm14  ;;  %vm305_vm10 = vcmp.eq.s32.totalorder %v296_v33, %v1667_v11  ;;  %vm314_vm11 = vcmp.eq.s32.totalorder %v296_v33, %v1668_v12  ;;  %vm379_vm14 = vcmask 523264   ;;  %v814_v11 = vld [vmem:[#allocation13 + $0x8] sm:$0xff] }
  0x31   :  { %v1601_v30 = vsel %vm319_vm15, 1.0, %v2080_v0  ;;  %vm320_vm4 = vmor %vm303_vm1, %vm312_vm2  ;;  %883 = vmatpush.msra.mxu3 %v815_v10 }
  0x32   :  { %v1602_v32 = vsel %vm320_vm4, 1.0, %v2080_v0  ;;  %vm321_vm8 = vmor %vm304_vm5, %vm313_vm7 }
  0x33   :  { %v1603_v34 = vsel %vm321_vm8, 1.0, %v2080_v0  ;;  %vm322_vm13 = vmor %vm305_vm10, %vm314_vm11  ;;  %884 = vmatpush.msra.mxu3 %v814_v11 }
  0x34   :  { %v1604_v35 = vsel %vm322_vm13, 1.0, %v2080_v0 }
  0x35   :  { %348 = vxpose.xlu0.b32.cont [2/8] (short) %v1598_v20, 128  ;;  %885 = vmatpush.msra.mxu3 %v813_v13 }
  0x36   :  { %1594 = vmatmul.msk.f32.gmra.mxu1 %vm187_vm0, %v193_v19 }
  0x37   :  { %1590 = vmatmul.msk.f32.gmra.mxu0 %vm187_vm0, %v193_v19 }
  0x3d   :  { %349 = vxpose.xlu0.b32.cont [3/8] (short) %v1599_v24, 128 }
  0x3e   :  { %1595 = vmatmul.msk.f32.gmra.mxu1 %vm187_vm0, %v194_v23 }
  0x3f   :  { %1591 = vmatmul.msk.f32.gmra.mxu0 %vm187_vm0, %v194_v23 }
  0x45   :  { %350 = vxpose.xlu0.b32.cont [4/8] (short) %v1600_v28, 128 }
  0x46   :  { %1596 = vmatmul.msk.f32.gmra.mxu1 %vm187_vm0, %v195_v27 }
  0x47   :  { %1592 = vmatmul.msk.f32.gmra.mxu0 %vm187_vm0, %v195_v27 }
  0x4d   :  { %351 = vxpose.xlu0.b32.cont [5/8] (short) %v1601_v30, 128 }
  0x55   :  { %352 = vxpose.xlu0.b32.cont [6/8] (short) %v1602_v32, 128 }
  0x5d   :  { %353 = vxpose.xlu0.b32.cont [7/8] (short) %v1603_v34, 128 }
  0x65   :  { %354 = vxpose.xlu0.b32.end [8/8] (short) %v1604_v35, 128 }
  0xab   :  { %v270_v37 = vpop.f32.mrf.mxu1 }
  0xac   :  { %v271_v38 = vadd.f32 %v1669_v36, %v270_v37  ;;  %v229_v39 = vpop.f32.mrf.mxu0 }
  0xad   :  { %241 = vst.msk [vmem:[#allocation3] sm:$0xff] %vm187_vm0, %v229_v39 }
  0xae   :  { %282 = vst.msk [vmem:[#allocation3 + $0x20] sm:$0xff] %vm187_vm0, %v271_v38 }
  0xb3   :  { %v273_v40 = vpop.f32.mrf.mxu1 }
  0xb4   :  { %v274_v41 = vadd.f32 %v1669_v36, %v273_v40  ;;  %v232_v42 = vpop.f32.mrf.mxu0  ;;  %v339_v57 = vld [vmem:[#allocation3] sm:$0xff] }
  0xb5   :  { %242 = vst.msk [vmem:[#allocation3 + $0x8] sm:$0xff] %vm187_vm0, %v232_v42  ;;  %v343_v52 = vld [vmem:[#allocation3 + $0x20] sm:$0xff] }
  0xb6   :  { %283 = vst.msk [vmem:[#allocation3 + $0x28] sm:$0xff] %vm187_vm0, %v274_v41 }
  0xbb   :  { %v276_v43 = vpop.f32.mrf.mxu1 }
  0xbc   :  { %v277_v44 = vadd.f32 %v1669_v36, %v276_v43  ;;  %v235_v45 = vpop.f32.mrf.mxu0  ;;  %v340_v56 = vld [vmem:[#allocation3 + $0x8] sm:$0xff] }
  0xbd   :  { %243 = vst.msk [vmem:[#allocation3 + $0x10] sm:$0xff] %vm187_vm0, %v235_v45  ;;  %v344_v51 = vld [vmem:[#allocation3 + $0x28] sm:$0xff] }
  0xbe   :  { %284 = vst.msk [vmem:[#allocation3 + $0x30] sm:$0xff] %vm187_vm0, %v277_v44 }
  0xc3   :  { %v279_v46 = vpop.f32.mrf.mxu1 }
  0xc4   :  { %v280_v47 = vadd.f32 %v1669_v36, %v279_v46  ;;  %v238_v48 = vpop.f32.mrf.mxu0  ;;  %v341_v55 = vld [vmem:[#allocation3 + $0x10] sm:$0xff] }
  0xc5   :  { %244 = vst.msk [vmem:[#allocation3 + $0x18] sm:$0xff] %vm187_vm0, %v238_v48  ;;  %v345_v50 = vld [vmem:[#allocation3 + $0x30] sm:$0xff] }
  0xc6   :  { %285 = vst.msk [vmem:[#allocation3 + $0x38] sm:$0xff] %vm187_vm0, %v280_v47 }
  0xcc   :  { %v342_v53 = vld [vmem:[#allocation3 + $0x18] sm:$0xff] }
  0xcd   :  { %v346_v49 = vld [vmem:[#allocation3 + $0x38] sm:$0xff] }
  0xce   :  { %436 = vmatpush.msra.mxu2 %v346_v49 }
  0xd0   :  { %437 = vmatpush.msra.mxu2 %v345_v50 }
  0xd1   :  { %v363_v54 = vpop.trf.xlu0 }
  0xd2   :  { %438 = vmatpush.msra.mxu2 %v344_v51 }
  0xd4   :  { %439 = vmatpush.msra.mxu2 %v343_v52 }
  0xd6   :  { %440 = vmatpush.msra.mxu2 %v342_v53 }
  0xd8   :  { %441 = vmatpush.msra.mxu2 %v341_v55 }
  0xd9   :  { %v364_v58 = vpop.trf.xlu0 }
  0xda   :  { %442 = vmatpush.msra.mxu2 %v340_v56 }
  0xdc   :  { %443 = vmatpush.msra.mxu2 %v339_v57 }
  0xdd   :  { %1605 = vmatmul.msk.f32.vlgmr.msra.gmra.mxu2 %vm379_vm14, %v363_v54 }
  0xe1   :  { %v365_v59 = vpop.trf.xlu0 }
  0xe5   :  { %1606 = vmatmul.msk.f32.gmra.mxu2 %vm379_vm14, %v364_v58 }
  0xe9   :  { %v366_v60 = vpop.trf.xlu0 }
  0xed   :  { %1607 = vmatmul.msk.f32.gmra.mxu2 %vm379_vm14, %v365_v59 }
  0xf1   :  { %v367_v61 = vpop.trf.xlu0 }
  0xf5   :  { %1608 = vmatmul.msk.f32.gmra.mxu2 %vm379_vm14, %v366_v60 }
  0xf9   :  { %v368_v62 = vpop.trf.xlu0 }
  0xfd   :  { %1609 = vmatmul.msk.f32.gmra.mxu2 %vm379_vm14, %v367_v61 }
 0x101   :  { %v369_v63 = vpop.trf.xlu0 }
 0x105   :  { %1610 = vmatmul.msk.f32.gmra.mxu2 %vm379_vm14, %v368_v62 }
 0x109   :  { %v370_v0 = vpop.trf.xlu0 }
 0x10d   :  { %1611 = vmatmul.msk.f32.gmra.mxu2 %vm379_vm14, %v369_v63 }
 0x111   :  { %v371_v1 = vpop.trf.xlu0 }
 0x115   :  { %1612 = vmatmul.msk.f32.gmra.mxu2 %vm379_vm14, %v370_v0 }
 0x119   :  { %v372_v2 = vpop.trf.xlu0 }
 0x11d   :  { %1613 = vmatmul.msk.f32.gmra.mxu2 %vm379_vm14, %v371_v1 }
 0x121   :  { %v373_v3 = vpop.trf.xlu0 }
 0x125   :  { %1614 = vmatmul.msk.f32.gmra.mxu2 %vm379_vm14, %v372_v2 }
 0x129   :  { %v374_v4 = vpop.trf.xlu0 }
 0x12d   :  { %1615 = vmatmul.msk.f32.gmra.mxu2 %vm379_vm14, %v373_v3 }
 0x131   :  { %v375_v5 = vpop.trf.xlu0 }
 0x135   :  { %1616 = vmatmul.msk.f32.gmra.mxu2 %vm379_vm14, %v374_v4 }
 0x139   :  { %v376_v6 = vpop.trf.xlu0 }
 0x13d   :  { %1617 = vmatmul.msk.f32.gmra.mxu2 %vm379_vm14, %v375_v5 }
 0x141   :  { %v377_v7 = vpop.trf.xlu0 }
 0x145   :  { %1618 = vmatmul.msk.f32.gmra.mxu2 %vm379_vm14, %v376_v6 }
 0x149   :  { %v378_v8 = vpop.trf.xlu0 }
 0x14d   :  { %1619 = vmatmul.msk.f32.gmra.mxu2 %vm379_vm14, %v377_v7 }
 0x155   :  { %1620 = vmatmul.msk.f32.gmra.mxu2 %vm379_vm14, %v378_v8 }
 0x160   :  { %v445_v12 = vpop.f32.mrf.mxu2 }
 0x161   :  { %v493_v14 = vsub.f32 0.0, %v445_v12 }
 0x163   :  { %v509_v16 = vmul.f32 1.442695, %v493_v14 }
 0x165   :  { %1673 = vpow2.f32 %v509_v16 }
 0x168   :  { %v448_v18 = vpop.f32.mrf.mxu2 }
 0x169   :  { %v494_v19 = vsub.f32 0.0, %v448_v18 }
 0x16b   :  { %v1674_v20 = vpop.eup %1673  ;;  %v511_v22 = vmul.f32 1.442695, %v494_v19 }
 0x16c   :  { %v541_v23 = vadd.f32 1.0, %v1674_v20 }
 0x16d   :  { %1675 = vpow2.f32 %v511_v22 }
 0x16e   :  { %1677 = vrcp.f32 %v541_v23  ;;  %v568_v33 = vand.u32 2147483648, %v541_v23  ;;  %v566_v36 = vand.u32 2147483647, %v541_v23  ;;  %vm562_vm1 = vweird.f32 %v541_v23 }
 0x170   :  { %v2281_v24 = vpop.f32.mrf.mxu2  ;;  %v569_v42 = vor.u32 1.1754944e-38, %v568_v33  ;;  %vm567_vm4 = vcmp.eq.f32.partialorder %v566_v36, 8.507059e+37 }
 0x171   :  { %v495_v26 = vsub.f32 0.0, %v2281_v24 }
 0x173   :  { %v1676_v27 = vpop.eup %1675  ;;  %v513_v28 = vmul.f32 1.442695, %v495_v26 }
 0x174   :  { %v1678_v29 = vpop.eup %1677  ;;  %v542_v30 = vadd.f32 1.0, %v1676_v27 }
 0x175   :  { %v558_v31 = vmul.f32 %v1678_v29, %v541_v23  ;;  %1679 = vpow2.f32 %v513_v28  ;;  %vm563_vm15 = vweird.f32 %v1678_v29 }
 0x176   :  { %1681 = vrcp.f32 %v542_v30  ;;  %vm564_vm2 = vmor %vm562_vm1, %vm563_vm15  ;;  %v583_v49 = vand.u32 2147483648, %v542_v30  ;;  %v581_v52 = vand.u32 2147483647, %v542_v30  ;;  %vm577_vm7 = vweird.f32 %v542_v30 }
 0x177   :  { %v559_v32 = vsub.f32 1.0, %v558_v31 }
 0x178   :  { %v2284_v34 = vpop.f32.mrf.mxu2  ;;  %v584_v58 = vor.u32 1.1754944e-38, %v583_v49  ;;  %vm582_vm10 = vcmp.eq.f32.partialorder %v581_v52, 8.507059e+37 }
 0x179   :  { %v560_v35 = vmul.f32 %v1678_v29, %v559_v32  ;;  %v496_v37 = vsub.f32 0.0, %v2284_v34 }
 0x17b   :  { %v1680_v38 = vpop.eup %1679  ;;  %v561_v39 = vadd.f32 %v1678_v29, %v560_v35  ;;  %v515_v40 = vmul.f32 1.442695, %v496_v37 }
 0x17c   :  { %v1682_v41 = vpop.eup %1681  ;;  %v543_v43 = vadd.f32 1.0, %v1680_v38 }
 0x17d   :  { %v565_v44 = vsel %vm564_vm2, %v1678_v29, %v561_v39  ;;  %v573_v45 = vmul.f32 %v1682_v41, %v542_v30  ;;  %1683 = vpow2.f32 %v515_v40  ;;  %vm578_vm5 = vweird.f32 %v1682_v41 }
 0x17e   :  { %v570_v46 = vsel %vm567_vm4, %v569_v42, %v565_v44  ;;  %1685 = vrcp.f32 %v543_v43  ;;  %vm579_vm8 = vmor %vm577_vm7, %vm578_vm5  ;;  %v598_v1 = vand.u32 2147483648, %v543_v43  ;;  %v596_v4 = vand.u32 2147483647, %v543_v43 }
 0x17f   :  { %v797_v47 = vmul.f32 %v570_v46, %v445_v12  ;;  %v574_v48 = vsub.f32 1.0, %v573_v45  ;;  %vm592_vm13 = vweird.f32 %v543_v43 }
 0x180   :  { %v2287_v50 = vpop.f32.mrf.mxu2  ;;  %v599_v10 = vor.u32 1.1754944e-38, %v598_v1  ;;  %vm597_vm15 = vcmp.eq.f32.partialorder %v596_v4, 8.507059e+37 }
 0x181   :  { %v575_v51 = vmul.f32 %v1682_v41, %v574_v48  ;;  %v497_v53 = vsub.f32 0.0, %v2287_v50  ;;  %1621 = vmatmul.msk.f32.vlgmr.msra.gmra.mxu3 %vm187_vm0, %v797_v47 }
 0x183   :  { %v1684_v54 = vpop.eup %1683  ;;  %v576_v55 = vadd.f32 %v1682_v41, %v575_v51  ;;  %v517_v56 = vmul.f32 1.442695, %v497_v53 }
 0x184   :  { %v1686_v57 = vpop.eup %1685  ;;  %v544_v59 = vadd.f32 1.0, %v1684_v54 }
 0x185   :  { %v580_v60 = vsel %vm579_vm8, %v1682_v41, %v576_v55  ;;  %v588_v61 = vmul.f32 %v1686_v57, %v543_v43  ;;  %1687 = vpow2.f32 %v517_v56  ;;  %vm593_vm11 = vweird.f32 %v1686_v57 }
 0x186   :  { %v585_v62 = vsel %vm582_vm10, %v584_v58, %v580_v60  ;;  %1689 = vrcp.f32 %v544_v59  ;;  %vm594_vm14 = vmor %vm592_vm13, %vm593_vm11  ;;  %v613_v19 = vand.u32 2147483648, %v544_v59  ;;  %v611_v23 = vand.u32 2147483647, %v544_v59 }
 0x187   :  { %v798_v63 = vmul.f32 %v585_v62, %v448_v18  ;;  %v589_v0 = vsub.f32 1.0, %v588_v61  ;;  %vm607_vm2 = vweird.f32 %v544_v59 }
 0x188   :  { %v2291_v2 = vpop.f32.mrf.mxu2  ;;  %v614_v31 = vor.u32 1.1754944e-38, %v613_v19  ;;  %vm612_vm5 = vcmp.eq.f32.partialorder %v611_v23, 8.507059e+37 }
 0x189   :  { %v590_v3 = vmul.f32 %v1686_v57, %v589_v0  ;;  %v498_v5 = vsub.f32 0.0, %v2291_v2  ;;  %1622 = vmatmul.msk.f32.gmra.mxu3 %vm187_vm0, %v798_v63 }
 0x18b   :  { %v1688_v6 = vpop.eup %1687  ;;  %v591_v7 = vadd.f32 %v1686_v57, %v590_v3  ;;  %v519_v8 = vmul.f32 1.442695, %v498_v5 }
 0x18c   :  { %v1690_v9 = vpop.eup %1689  ;;  %v545_v11 = vadd.f32 1.0, %v1688_v6 }
 0x18d   :  { %v595_v12 = vsel %vm594_vm14, %v1686_v57, %v591_v7  ;;  %v603_v13 = vmul.f32 %v1690_v9, %v544_v59  ;;  %1691 = vpow2.f32 %v519_v8  ;;  %vm608_vm1 = vweird.f32 %v1690_v9 }
 0x18e   :  { %v600_v14 = vsel %vm597_vm15, %v599_v10, %v595_v12  ;;  %1693 = vrcp.f32 %v545_v11  ;;  %vm609_vm4 = vmor %vm607_vm2, %vm608_vm1  ;;  %v628_v38 = vand.u32 2147483648, %v545_v11  ;;  %v626_v41 = vand.u32 2147483647, %v545_v11 }
 0x18f   :  { %v799_v16 = vmul.f32 %v600_v14, %v2281_v24  ;;  %v604_v18 = vsub.f32 1.0, %v603_v13  ;;  %vm622_vm8 = vweird.f32 %v545_v11 }
 0x190   :  { %v2296_v20 = vpop.f32.mrf.mxu2  ;;  %v629_v47 = vor.u32 1.1754944e-38, %v628_v38  ;;  %vm627_vm11 = vcmp.eq.f32.partialorder %v626_v41, 8.507059e+37 }
 0x191   :  { %v605_v22 = vmul.f32 %v1690_v9, %v604_v18  ;;  %v499_v26 = vsub.f32 0.0, %v2296_v20  ;;  %1623 = vmatmul.msk.f32.gmra.mxu3 %vm187_vm0, %v799_v16 }
 0x193   :  { %v1692_v27 = vpop.eup %1691  ;;  %v606_v28 = vadd.f32 %v1690_v9, %v605_v22  ;;  %v521_v29 = vmul.f32 1.442695, %v499_v26 }
 0x194   :  { %v1694_v30 = vpop.eup %1693  ;;  %v546_v32 = vadd.f32 1.0, %v1692_v27 }
 0x195   :  { %v610_v24 = vsel %vm609_vm4, %v1690_v9, %v606_v28  ;;  %v618_v33 = vmul.f32 %v1694_v30, %v545_v11  ;;  %1695 = vpow2.f32 %v521_v29  ;;  %vm623_vm7 = vweird.f32 %v1694_v30 }
 0x196   :  { %v615_v35 = vsel %vm612_vm5, %v614_v31, %v610_v24  ;;  %1697 = vrcp.f32 %v546_v32  ;;  %vm624_vm10 = vmor %vm622_vm8, %vm623_vm7  ;;  %v643_v54 = vand.u32 2147483648, %v546_v32  ;;  %v641_v57 = vand.u32 2147483647, %v546_v32 }
 0x197   :  { %v800_v36 = vmul.f32 %v615_v35, %v2284_v34  ;;  %v619_v37 = vsub.f32 1.0, %v618_v33  ;;  %vm637_vm14 = vweird.f32 %v546_v32 }
 0x198   :  { %v2301_v39 = vpop.f32.mrf.mxu2  ;;  %v644_v63 = vor.u32 1.1754944e-38, %v643_v54  ;;  %vm642_vm1 = vcmp.eq.f32.partialorder %v641_v57, 8.507059e+37 }
 0x199   :  { %v620_v40 = vmul.f32 %v1694_v30, %v619_v37  ;;  %v500_v42 = vsub.f32 0.0, %v2301_v39  ;;  %1624 = vmatmul.msk.f32.gmra.mxu3 %vm187_vm0, %v800_v36 }
 0x19b   :  { %v1696_v43 = vpop.eup %1695  ;;  %v621_v44 = vadd.f32 %v1694_v30, %v620_v40  ;;  %v523_v45 = vmul.f32 1.442695, %v500_v42 }
 0x19c   :  { %v1698_v46 = vpop.eup %1697  ;;  %v547_v48 = vadd.f32 1.0, %v1696_v43 }
 0x19d   :  { %v625_v34 = vsel %vm624_vm10, %v1694_v30, %v621_v44  ;;  %v633_v49 = vmul.f32 %v1698_v46, %v546_v32  ;;  %1699 = vpow2.f32 %v523_v45  ;;  %vm638_vm13 = vweird.f32 %v1698_v46 }
 0x19e   :  { %v630_v51 = vsel %vm627_vm11, %v629_v47, %v625_v34  ;;  %1701 = vrcp.f32 %v547_v48  ;;  %vm639_vm15 = vmor %vm637_vm14, %vm638_vm13  ;;  %v658_v6 = vand.u32 2147483648, %v547_v48  ;;  %v656_v9 = vand.u32 2147483647, %v547_v48 }
 0x19f   :  { %v801_v52 = vmul.f32 %v630_v51, %v2287_v50  ;;  %v634_v53 = vsub.f32 1.0, %v633_v49  ;;  %vm652_vm4 = vweird.f32 %v547_v48 }
 0x1a0   :  { %v2306_v55 = vpop.f32.mrf.mxu2  ;;  %v659_v16 = vor.u32 1.1754944e-38, %v658_v6  ;;  %vm657_vm7 = vcmp.eq.f32.partialorder %v656_v9, 8.507059e+37 }
 0x1a1   :  { %v635_v56 = vmul.f32 %v1698_v46, %v634_v53  ;;  %v501_v58 = vsub.f32 0.0, %v2306_v55  ;;  %1625 = vmatmul.msk.f32.gmra.mxu3 %vm187_vm0, %v801_v52 }
 0x1a3   :  { %v1700_v59 = vpop.eup %1699  ;;  %v636_v60 = vadd.f32 %v1698_v46, %v635_v56  ;;  %v525_v61 = vmul.f32 1.442695, %v501_v58 }
 0x1a4   :  { %v1702_v62 = vpop.eup %1701  ;;  %v548_v0 = vadd.f32 1.0, %v1700_v59 }
 0x1a5   :  { %v640_v50 = vsel %vm639_vm15, %v1698_v46, %v636_v60  ;;  %v648_v1 = vmul.f32 %v1702_v62, %v547_v48  ;;  %1703 = vpow2.f32 %v525_v61  ;;  %vm653_vm2 = vweird.f32 %v1702_v62 }
 0x1a6   :  { %v645_v3 = vsel %vm642_vm1, %v644_v63, %v640_v50  ;;  %1705 = vrcp.f32 %v548_v0  ;;  %vm654_vm5 = vmor %vm652_vm4, %vm653_vm2  ;;  %v673_v27 = vand.u32 2147483648, %v548_v0  ;;  %v671_v30 = vand.u32 2147483647, %v548_v0 }
 0x1a7   :  { %v802_v4 = vmul.f32 %v645_v3, %v2291_v2  ;;  %v649_v5 = vsub.f32 1.0, %v648_v1  ;;  %vm667_vm10 = vweird.f32 %v548_v0 }
 0x1a8   :  { %v2311_v7 = vpop.f32.mrf.mxu2  ;;  %v674_v36 = vor.u32 1.1754944e-38, %v673_v27  ;;  %vm672_vm13 = vcmp.eq.f32.partialorder %v671_v30, 8.507059e+37 }
 0x1a9   :  { %v650_v8 = vmul.f32 %v1702_v62, %v649_v5  ;;  %v502_v10 = vsub.f32 0.0, %v2311_v7  ;;  %1626 = vmatmul.msk.f32.gmra.mxu3 %vm187_vm0, %v802_v4 }
 0x1ab   :  { %v1704_v11 = vpop.eup %1703  ;;  %v651_v12 = vadd.f32 %v1702_v62, %v650_v8  ;;  %v527_v13 = vmul.f32 1.442695, %v502_v10 }
 0x1ac   :  { %v1706_v14 = vpop.eup %1705  ;;  %v549_v18 = vadd.f32 1.0, %v1704_v11 }
 0x1ad   :  { %v655_v2 = vsel %vm654_vm5, %v1702_v62, %v651_v12  ;;  %v663_v19 = vmul.f32 %v1706_v14, %v548_v0  ;;  %1707 = vpow2.f32 %v527_v13  ;;  %vm668_vm8 = vweird.f32 %v1706_v14 }
 0x1ae   :  { %v660_v22 = vsel %vm657_vm7, %v659_v16, %v655_v2  ;;  %1709 = vrcp.f32 %v549_v18  ;;  %vm669_vm11 = vmor %vm667_vm10, %vm668_vm8  ;;  %v688_v43 = vand.u32 2147483648, %v549_v18  ;;  %v686_v46 = vand.u32 2147483647, %v549_v18 }
 0x1af   :  { %v803_v23 = vmul.f32 %v660_v22, %v2296_v20  ;;  %v664_v26 = vsub.f32 1.0, %v663_v19  ;;  %vm682_vm15 = vweird.f32 %v549_v18 }
 0x1b0   :  { %v2316_v28 = vpop.f32.mrf.mxu2  ;;  %v689_v52 = vor.u32 1.1754944e-38, %v688_v43  ;;  %vm687_vm2 = vcmp.eq.f32.partialorder %v686_v46, 8.507059e+37 }
 0x1b1   :  { %v665_v29 = vmul.f32 %v1706_v14, %v664_v26  ;;  %v503_v31 = vsub.f32 0.0, %v2316_v28  ;;  %1627 = vmatmul.msk.f32.gmra.mxu3 %vm187_vm0, %v803_v23 }
 0x1b3   :  { %v1708_v32 = vpop.eup %1707  ;;  %v666_v24 = vadd.f32 %v1706_v14, %v665_v29  ;;  %v529_v33 = vmul.f32 1.442695, %v503_v31 }
 0x1b4   :  { %v1710_v35 = vpop.eup %1709  ;;  %v550_v37 = vadd.f32 1.0, %v1708_v32 }
 0x1b5   :  { %v670_v20 = vsel %vm669_vm11, %v1706_v14, %v666_v24  ;;  %v678_v38 = vmul.f32 %v1710_v35, %v549_v18  ;;  %1711 = vpow2.f32 %v529_v33  ;;  %vm683_vm14 = vweird.f32 %v1710_v35 }
 0x1b6   :  { %v675_v40 = vsel %vm672_vm13, %v674_v36, %v670_v20  ;;  %1713 = vrcp.f32 %v550_v37  ;;  %vm684_vm1 = vmor %vm682_vm15, %vm683_vm14  ;;  %v703_v59 = vand.u32 2147483648, %v550_v37  ;;  %v701_v62 = vand.u32 2147483647, %v550_v37 }
 0x1b7   :  { %v804_v41 = vmul.f32 %v675_v40, %v2301_v39  ;;  %v679_v42 = vsub.f32 1.0, %v678_v38  ;;  %vm697_vm5 = vweird.f32 %v550_v37 }
 0x1b8   :  { %v2321_v44 = vpop.f32.mrf.mxu2  ;;  %v704_v4 = vor.u32 1.1754944e-38, %v703_v59  ;;  %vm702_vm8 = vcmp.eq.f32.partialorder %v701_v62, 8.507059e+37 }
 0x1b9   :  { %v680_v45 = vmul.f32 %v1710_v35, %v679_v42  ;;  %v504_v47 = vsub.f32 0.0, %v2321_v44  ;;  %1628 = vmatmul.msk.f32.gmra.mxu3 %vm187_vm0, %v804_v41 }
 0x1bb   :  { %v1712_v48 = vpop.eup %1711  ;;  %v681_v34 = vadd.f32 %v1710_v35, %v680_v45  ;;  %v531_v49 = vmul.f32 1.442695, %v504_v47 }
 0x1bc   :  { %v1714_v51 = vpop.eup %1713  ;;  %v551_v53 = vadd.f32 1.0, %v1712_v48 }
 0x1bd   :  { %v685_v39 = vsel %vm684_vm1, %v1710_v35, %v681_v34  ;;  %v693_v54 = vmul.f32 %v1714_v51, %v550_v37  ;;  %1715 = vpow2.f32 %v531_v49  ;;  %vm698_vm4 = vweird.f32 %v1714_v51 }
 0x1be   :  { %v690_v56 = vsel %vm687_vm2, %v689_v52, %v685_v39  ;;  %1717 = vrcp.f32 %v551_v53  ;;  %vm699_vm7 = vmor %vm697_vm5, %vm698_vm4  ;;  %v718_v11 = vand.u32 2147483648, %v551_v53  ;;  %v716_v14 = vand.u32 2147483647, %v551_v53 }
 0x1bf   :  { %v805_v57 = vmul.f32 %v690_v56, %v2306_v55  ;;  %v694_v58 = vsub.f32 1.0, %v693_v54  ;;  %vm712_vm11 = vweird.f32 %v551_v53 }
 0x1c0   :  { %v2326_v60 = vpop.f32.mrf.mxu2  ;;  %v719_v23 = vor.u32 1.1754944e-38, %v718_v11  ;;  %vm717_vm14 = vcmp.eq.f32.partialorder %v716_v14, 8.507059e+37 }
 0x1c1   :  { %v695_v61 = vmul.f32 %v1714_v51, %v694_v58  ;;  %v505_v63 = vsub.f32 0.0, %v2326_v60  ;;  %1629 = vmatmul.msk.f32.gmra.mxu3 %vm187_vm0, %v805_v57 }
 0x1c3   :  { %v1716_v0 = vpop.eup %1715  ;;  %v696_v50 = vadd.f32 %v1714_v51, %v695_v61  ;;  %v533_v1 = vmul.f32 1.442695, %v505_v63 }
 0x1c4   :  { %v1718_v3 = vpop.eup %1717  ;;  %v552_v5 = vadd.f32 1.0, %v1716_v0 }
 0x1c5   :  { %v700_v55 = vsel %vm699_vm7, %v1714_v51, %v696_v50  ;;  %v708_v6 = vmul.f32 %v1718_v3, %v551_v53  ;;  %1719 = vpow2.f32 %v533_v1  ;;  %vm713_vm10 = vweird.f32 %v1718_v3 }
 0x1c6   :  { %v705_v8 = vsel %vm702_vm8, %v704_v4, %v700_v55  ;;  %1721 = vrcp.f32 %v552_v5  ;;  %vm714_vm13 = vmor %vm712_vm11, %vm713_vm10  ;;  %v733_v32 = vand.u32 2147483648, %v552_v5  ;;  %v731_v35 = vand.u32 2147483647, %v552_v5 }
 0x1c7   :  { %v806_v9 = vmul.f32 %v705_v8, %v2311_v7  ;;  %v709_v10 = vsub.f32 1.0, %v708_v6  ;;  %vm727_vm1 = vweird.f32 %v552_v5 }
 0x1c8   :  { %v2331_v12 = vpop.f32.mrf.mxu2  ;;  %v734_v41 = vor.u32 1.1754944e-38, %v733_v32  ;;  %vm732_vm4 = vcmp.eq.f32.partialorder %v731_v35, 8.507059e+37 }
 0x1c9   :  { %v710_v13 = vmul.f32 %v1718_v3, %v709_v10  ;;  %v506_v16 = vsub.f32 0.0, %v2331_v12  ;;  %1630 = vmatmul.msk.f32.gmra.mxu3 %vm187_vm0, %v806_v9 }
 0x1cb   :  { %v1720_v18 = vpop.eup %1719  ;;  %v711_v2 = vadd.f32 %v1718_v3, %v710_v13  ;;  %v535_v19 = vmul.f32 1.442695, %v506_v16 }
 0x1cc   :  { %v1722_v22 = vpop.eup %1721  ;;  %v553_v26 = vadd.f32 1.0, %v1720_v18 }
 0x1cd   :  { %v715_v7 = vsel %vm714_vm13, %v1718_v3, %v711_v2  ;;  %v723_v27 = vmul.f32 %v1722_v22, %v552_v5  ;;  %1723 = vpow2.f32 %v535_v19  ;;  %vm728_vm15 = vweird.f32 %v1722_v22 }
 0x1ce   :  { %v720_v29 = vsel %vm717_vm14, %v719_v23, %v715_v7  ;;  %1725 = vrcp.f32 %v553_v26  ;;  %vm729_vm2 = vmor %vm727_vm1, %vm728_vm15  ;;  %v748_v48 = vand.u32 2147483648, %v553_v26  ;;  %v746_v51 = vand.u32 2147483647, %v553_v26 }
 0x1cf   :  { %v807_v30 = vmul.f32 %v720_v29, %v2316_v28  ;;  %v724_v31 = vsub.f32 1.0, %v723_v27  ;;  %vm742_vm7 = vweird.f32 %v553_v26 }
 0x1d0   :  { %v2336_v24 = vpop.f32.mrf.mxu2  ;;  %v749_v57 = vor.u32 1.1754944e-38, %v748_v48  ;;  %vm747_vm10 = vcmp.eq.f32.partialorder %v746_v51, 8.507059e+37 }
 0x1d1   :  { %v725_v33 = vmul.f32 %v1722_v22, %v724_v31  ;;  %v507_v36 = vsub.f32 0.0, %v2336_v24  ;;  %1631 = vmatmul.msk.f32.gmra.mxu3 %vm187_vm0, %v807_v30 }
 0x1d3   :  { %v1724_v37 = vpop.eup %1723  ;;  %v726_v20 = vadd.f32 %v1722_v22, %v725_v33  ;;  %v537_v38 = vmul.f32 1.442695, %v507_v36 }
 0x1d4   :  { %v1726_v40 = vpop.eup %1725  ;;  %v554_v42 = vadd.f32 1.0, %v1724_v37 }
 0x1d5   :  { %v730_v28 = vsel %vm729_vm2, %v1722_v22, %v726_v20  ;;  %v738_v43 = vmul.f32 %v1726_v40, %v553_v26  ;;  %1727 = vpow2.f32 %v537_v38  ;;  %vm743_vm5 = vweird.f32 %v1726_v40 }
 0x1d6   :  { %v735_v45 = vsel %vm732_vm4, %v734_v41, %v730_v28  ;;  %1729 = vrcp.f32 %v554_v42  ;;  %vm744_vm8 = vmor %vm742_vm7, %vm743_vm5  ;;  %v763_v0 = vand.u32 2147483648, %v554_v42  ;;  %v761_v1 = vand.u32 2147483647, %v554_v42 }
 0x1d7   :  { %v808_v46 = vmul.f32 %v735_v45, %v2321_v44  ;;  %v739_v47 = vsub.f32 1.0, %v738_v43  ;;  %vm757_vm13 = vweird.f32 %v554_v42 }
 0x1d8   :  { %v2341_v34 = vpop.f32.mrf.mxu2  ;;  %v764_v55 = vor.u32 1.1754944e-38, %v763_v0  ;;  %vm762_vm15 = vcmp.eq.f32.partialorder %v761_v1, 8.507059e+37 }
 0x1d9   :  { %v740_v49 = vmul.f32 %v1726_v40, %v739_v47  ;;  %v508_v52 = vsub.f32 0.0, %v2341_v34  ;;  %1632 = vmatmul.msk.f32.gmra.mxu3 %vm187_vm0, %v808_v46 }
 0x1db   :  { %v1728_v53 = vpop.eup %1727  ;;  %v741_v39 = vadd.f32 %v1726_v40, %v740_v49  ;;  %v539_v54 = vmul.f32 1.442695, %v508_v52 }
 0x1dc   :  { %v1730_v56 = vpop.eup %1729  ;;  %v555_v58 = vadd.f32 1.0, %v1728_v53 }
 0x1dd   :  { %v745_v44 = vsel %vm744_vm8, %v1726_v40, %v741_v39  ;;  %v753_v59 = vmul.f32 %v1730_v56, %v554_v42  ;;  %1731 = vpow2.f32 %v539_v54  ;;  %vm758_vm11 = vweird.f32 %v1730_v56 }
 0x1de   :  { %v750_v61 = vsel %vm747_vm10, %v749_v57, %v745_v44  ;;  %1733 = vrcp.f32 %v555_v58  ;;  %vm759_vm14 = vmor %vm757_vm13, %vm758_vm11  ;;  %v778_v13 = vand.u32 2147483648, %v555_v58  ;;  %v776_v16 = vand.u32 2147483647, %v555_v58 }
 0x1df   :  { %v809_v62 = vmul.f32 %v750_v61, %v2326_v60  ;;  %v754_v63 = vsub.f32 1.0, %v753_v59  ;;  %vm772_vm2 = vweird.f32 %v555_v58 }
 0x1e0   :  { %v779_v19 = vor.u32 1.1754944e-38, %v778_v13  ;;  %vm777_vm5 = vcmp.eq.f32.partialorder %v776_v16, 8.507059e+37 }
 0x1e1   :  { %v755_v50 = vmul.f32 %v1730_v56, %v754_v63  ;;  %1633 = vmatmul.msk.f32.gmra.mxu3 %vm187_vm0, %v809_v62 }
 0x1e3   :  { %v1732_v3 = vpop.eup %1731  ;;  %v756_v4 = vadd.f32 %v1730_v56, %v755_v50 }
 0x1e4   :  { %v1734_v5 = vpop.eup %1733  ;;  %v556_v6 = vadd.f32 1.0, %v1732_v3 }
 0x1e5   :  { %v760_v8 = vsel %vm759_vm14, %v1730_v56, %v756_v4  ;;  %v768_v9 = vmul.f32 %v1734_v5, %v555_v58  ;;  %vm773_vm1 = vweird.f32 %v1734_v5 }
 0x1e6   :  { %v765_v10 = vsel %vm762_vm15, %v764_v55, %v760_v8  ;;  %1735 = vrcp.f32 %v556_v6  ;;  %vm774_vm4 = vmor %vm772_vm2, %vm773_vm1  ;;  %v791_v30 = vand.u32 2147483647, %v556_v6  ;;  %vm787_vm8 = vweird.f32 %v556_v6 }
 0x1e7   :  { %v810_v60 = vmul.f32 %v765_v10, %v2331_v12  ;;  %v769_v11 = vsub.f32 1.0, %v768_v9  ;;  %v793_v12 = vand.u32 2147483648, %v556_v6 }
 0x1e8   :  { %vm792_vm11 = vcmp.eq.f32.partialorder %v791_v30, 8.507059e+37 }
 0x1e9   :  { %v770_v14 = vmul.f32 %v1734_v5, %v769_v11  ;;  %1634 = vmatmul.msk.f32.gmra.mxu3 %vm187_vm0, %v810_v60  ;;  %v794_v32 = vor.u32 1.1754944e-38, %v793_v12 }
 0x1eb   :  { %v771_v18 = vadd.f32 %v1734_v5, %v770_v14 }
 0x1ec   :  { %v1736_v2 = vpop.eup %1735 }
 0x1ed   :  { %v775_v22 = vsel %vm774_vm4, %v1734_v5, %v771_v18  ;;  %v783_v23 = vmul.f32 %v1736_v2, %v556_v6  ;;  %vm788_vm7 = vweird.f32 %v1736_v2 }
 0x1ee   :  { %v780_v26 = vsel %vm777_vm5, %v779_v19, %v775_v22  ;;  %vm789_vm10 = vmor %vm787_vm8, %vm788_vm7 }
 0x1ef   :  { %v811_v7 = vmul.f32 %v780_v26, %v2336_v24  ;;  %v784_v27 = vsub.f32 1.0, %v783_v23  ;;  %v2356_v24 = vld [vmem:[%s2621_s7] ss:$0 sm:$0xff] }
 0x1f1   :  { %v785_v29 = vmul.f32 %v1736_v2, %v784_v27  ;;  %1635 = vmatmul.msk.f32.gmra.mxu3 %vm187_vm0, %v811_v7 }
 0x1f3   :  { %v786_v31 = vadd.f32 %v1736_v2, %v785_v29 }
 0x1f5   :  { %v790_v33 = vsel %vm789_vm10, %v1736_v2, %v786_v31 }
 0x1f6   :  { %v795_v35 = vsel %vm792_vm11, %v794_v32, %v790_v33 }
 0x1f7   :  { %v812_v36 = vmul.f32 %v795_v35, %v2341_v34 }
 0x1f9   :  { %1636 = vmatmul.msk.f32.gmra.mxu3 %vm187_vm0, %v812_v36 }
 0x204   :  { %v887_v37 = vpop.f32.mrf.mxu3 }
 0x205   :  { %v888_v20 = vadd.f32 %v2356_v24, %v887_v37 }
 0x207   :  { %v935_v38 = vsub.f32 0.0, %v888_v20 }
 0x209   :  { %v951_v40 = vmul.f32 1.442695, %v935_v38 }
 0x20b   :  { %1737 = vpow2.f32 %v951_v40 }
 0x20c   :  { %v890_v41 = vpop.f32.mrf.mxu3 }
 0x20d   :  { %v2360_v42 = vadd.f32 %v2356_v24, %v890_v41 }
 0x20f   :  { %v936_v28 = vsub.f32 0.0, %v2360_v42 }
 0x211   :  { %v1738_v43 = vpop.eup %1737  ;;  %v953_v45 = vmul.f32 1.442695, %v936_v28 }
 0x212   :  { %v983_v46 = vadd.f32 1.0, %v1738_v43 }
 0x213   :  { %1739 = vpow2.f32 %v953_v45 }
 0x214   :  { %1741 = vrcp.f32 %v983_v46  ;;  %v893_v47 = vpop.f32.mrf.mxu3  ;;  %v1010_v59 = vand.u32 2147483648, %v983_v46  ;;  %v1008_v61 = vand.u32 2147483647, %v983_v46  ;;  %vm1004_vm14 = vweird.f32 %v983_v46 }
 0x215   :  { %v2364_v48 = vadd.f32 %v2356_v24, %v893_v47 }
 0x216   :  { %v1011_v5 = vor.u32 1.1754944e-38, %v1010_v59  ;;  %vm1009_vm1 = vcmp.eq.f32.partialorder %v1008_v61, 8.507059e+37 }
 0x217   :  { %v937_v34 = vsub.f32 0.0, %v2364_v48 }
 0x219   :  { %v1740_v49 = vpop.eup %1739  ;;  %v955_v51 = vmul.f32 1.442695, %v937_v34 }
 0x21a   :  { %v1742_v52 = vpop.eup %1741  ;;  %v984_v53 = vadd.f32 1.0, %v1740_v49 }
 0x21b   :  { %1743 = vpow2.f32 %v955_v51  ;;  %v1000_v39 = vmul.f32 %v1742_v52, %v983_v46  ;;  %vm1005_vm13 = vweird.f32 %v1742_v52 }
 0x21c   :  { %1745 = vrcp.f32 %v984_v53  ;;  %v896_v54 = vpop.f32.mrf.mxu3  ;;  %vm1006_vm15 = vmor %vm1004_vm14, %vm1005_vm13  ;;  %v1025_v13 = vand.u32 2147483648, %v984_v53  ;;  %v1023_v14 = vand.u32 2147483647, %v984_v53  ;;  %vm1019_vm4 = vweird.f32 %v984_v53 }
 0x21d   :  { %v2368_v56 = vadd.f32 %v2356_v24, %v896_v54  ;;  %v1001_v57 = vsub.f32 1.0, %v1000_v39 }
 0x21e   :  { %v1026_v7 = vor.u32 1.1754944e-38, %v1025_v13  ;;  %vm1024_vm7 = vcmp.eq.f32.partialorder %v1023_v14, 8.507059e+37 }
 0x21f   :  { %v938_v58 = vsub.f32 0.0, %v2368_v56  ;;  %v1002_v44 = vmul.f32 %v1742_v52, %v1001_v57 }
 0x221   :  { %v1744_v62 = vpop.eup %1743  ;;  %v957_v63 = vmul.f32 1.442695, %v938_v58  ;;  %v1003_v0 = vadd.f32 %v1742_v52, %v1002_v44 }
 0x222   :  { %v1746_v50 = vpop.eup %1745  ;;  %v985_v1 = vadd.f32 1.0, %v1744_v62 }
 0x223   :  { %1747 = vpow2.f32 %v957_v63  ;;  %v1015_v3 = vmul.f32 %v1746_v50, %v984_v53  ;;  %v1007_v4 = vsel %vm1006_vm15, %v1742_v52, %v1003_v0  ;;  %vm1020_vm2 = vweird.f32 %v1746_v50 }
 0x224   :  { %1749 = vrcp.f32 %v985_v1  ;;  %v899_v55 = vpop.f32.mrf.mxu3  ;;  %v1012_v9 = vsel %vm1009_vm1, %v1011_v5, %v1007_v4  ;;  %vm1021_vm5 = vmor %vm1019_vm4, %vm1020_vm2  ;;  %v1040_v35 = vand.u32 2147483648, %v985_v1  ;;  %v1038_v36 = vand.u32 2147483647, %v985_v1 }
 0x225   :  { %v2372_v6 = vadd.f32 %v2356_v24, %v899_v55  ;;  %v1016_v8 = vsub.f32 1.0, %v1015_v3  ;;  %v2374_v10 = vmul.f32 %v1012_v9, %v888_v20  ;;  %vm1034_vm10 = vweird.f32 %v985_v1 }
 0x226   :  { %v1041_v43 = vor.u32 1.1754944e-38, %v1040_v35  ;;  %vm1039_vm13 = vcmp.eq.f32.partialorder %v1038_v36, 8.507059e+37 }
 0x227   :  { %v939_v60 = vsub.f32 0.0, %v2372_v6  ;;  %v1017_v11 = vmul.f32 %v1746_v50, %v1016_v8  ;;  %1255 = vst.msk [vmem:[%s2627_s13] sm:$0xff] %vm187_vm0, %v2374_v10 }
 0x229   :  { %v1748_v16 = vpop.eup %1747  ;;  %v959_v18 = vmul.f32 1.442695, %v939_v60  ;;  %v1018_v2 = vadd.f32 %v1746_v50, %v1017_v11 }
 0x22a   :  { %v1750_v19 = vpop.eup %1749  ;;  %v986_v22 = vadd.f32 1.0, %v1748_v16 }
 0x22b   :  { %1751 = vpow2.f32 %v959_v18  ;;  %v1030_v23 = vmul.f32 %v1750_v19, %v985_v1  ;;  %v1022_v26 = vsel %vm1021_vm5, %v1746_v50, %v1018_v2  ;;  %vm1035_vm8 = vweird.f32 %v1750_v19 }
 0x22c   :  { %1753 = vrcp.f32 %v986_v22  ;;  %v902_v27 = vpop.f32.mrf.mxu3  ;;  %v1027_v30 = vsel %vm1024_vm7, %v1026_v7, %v1022_v26  ;;  %vm1036_vm11 = vmor %vm1034_vm10, %vm1035_vm8  ;;  %v1055_v53 = vand.u32 2147483648, %v986_v22  ;;  %v1053_v39 = vand.u32 2147483647, %v986_v22 }
 0x22d   :  { %v2383_v12 = vadd.f32 %v2356_v24, %v902_v27  ;;  %v1031_v29 = vsub.f32 1.0, %v1030_v23  ;;  %v2386_v31 = vmul.f32 %v1027_v30, %v2360_v42  ;;  %vm1049_vm15 = vweird.f32 %v986_v22 }
 0x22e   :  { %v1056_v62 = vor.u32 1.1754944e-38, %v1055_v53  ;;  %vm1054_vm2 = vcmp.eq.f32.partialorder %v1053_v39, 8.507059e+37 }
 0x22f   :  { %v940_v32 = vsub.f32 0.0, %v2383_v12  ;;  %v1032_v33 = vmul.f32 %v1750_v19, %v1031_v29  ;;  %1256 = vst.msk [vmem:[%s2627_s13 + $0x8] sm:$0xff] %vm187_vm0, %v2386_v31 }
 0x231   :  { %v1752_v37 = vpop.eup %1751  ;;  %v961_v20 = vmul.f32 1.442695, %v940_v32  ;;  %v1033_v38 = vadd.f32 %v1750_v19, %v1032_v33 }
 0x232   :  { %v1754_v40 = vpop.eup %1753  ;;  %v987_v41 = vadd.f32 1.0, %v1752_v37 }
 0x233   :  { %1755 = vpow2.f32 %v961_v20  ;;  %v1045_v42 = vmul.f32 %v1754_v40, %v986_v22  ;;  %v1037_v28 = vsel %vm1036_vm11, %v1750_v19, %v1033_v38  ;;  %vm1050_vm14 = vweird.f32 %v1754_v40 }
 0x234   :  { %1757 = vrcp.f32 %v987_v41  ;;  %v905_v45 = vpop.f32.mrf.mxu3  ;;  %v1042_v34 = vsel %vm1039_vm13, %v1041_v43, %v1037_v28  ;;  %vm1051_vm1 = vmor %vm1049_vm15, %vm1050_vm14  ;;  %v1070_v55 = vand.u32 2147483648, %v987_v41  ;;  %v1068_v8 = vand.u32 2147483647, %v987_v41 }
 0x235   :  { %v2395_v46 = vadd.f32 %v2356_v24, %v905_v45  ;;  %v1046_v47 = vsub.f32 1.0, %v1045_v42  ;;  %v2398_v49 = vmul.f32 %v1042_v34, %v2364_v48  ;;  %vm1064_vm5 = vweird.f32 %v987_v41 }
 0x236   :  { %v1071_v18 = vor.u32 1.1754944e-38, %v1070_v55  ;;  %vm1069_vm8 = vcmp.eq.f32.partialorder %v1068_v8, 8.507059e+37 }
 0x237   :  { %v941_v51 = vsub.f32 0.0, %v2395_v46  ;;  %v1047_v52 = vmul.f32 %v1754_v40, %v1046_v47  ;;  %1257 = vst.msk [vmem:[%s2627_s13 + $0x10] sm:$0xff] %vm187_vm0, %v2398_v49 }
 0x239   :  { %v1756_v54 = vpop.eup %1755  ;;  %v963_v57 = vmul.f32 1.442695, %v941_v51  ;;  %v1048_v58 = vadd.f32 %v1754_v40, %v1047_v52 }
 0x23a   :  { %v1758_v44 = vpop.eup %1757  ;;  %v988_v59 = vadd.f32 1.0, %v1756_v54 }
 0x23b   :  { %1759 = vpow2.f32 %v963_v57  ;;  %v1060_v48 = vmul.f32 %v1758_v44, %v987_v41  ;;  %v1052_v61 = vsel %vm1051_vm1, %v1754_v40, %v1048_v58  ;;  %vm1065_vm4 = vweird.f32 %v1758_v44 }
 0x23c   :  { %1761 = vrcp.f32 %v988_v59  ;;  %v908_v63 = vpop.f32.mrf.mxu3  ;;  %v1057_v1 = vsel %vm1054_vm2, %v1056_v62, %v1052_v61  ;;  %vm1066_vm7 = vmor %vm1064_vm5, %vm1065_vm4  ;;  %v1085_v29 = vand.u32 2147483648, %v988_v59  ;;  %v1083_v30 = vand.u32 2147483647, %v988_v59 }
 0x23d   :  { %v2407_v0 = vadd.f32 %v2356_v24, %v908_v63  ;;  %v1061_v50 = vsub.f32 1.0, %v1060_v48  ;;  %v2410_v3 = vmul.f32 %v1057_v1, %v2368_v56  ;;  %vm1079_vm11 = vweird.f32 %v988_v59 }
 0x23e   :  { %v1086_v38 = vor.u32 1.1754944e-38, %v1085_v29  ;;  %vm1084_vm14 = vcmp.eq.f32.partialorder %v1083_v30, 8.507059e+37 }
 0x23f   :  { %v942_v4 = vsub.f32 0.0, %v2407_v0  ;;  %v1062_v5 = vmul.f32 %v1758_v44, %v1061_v50  ;;  %1258 = vst.msk [vmem:[%s2627_s13 + $0x18] sm:$0xff] %vm187_vm0, %v2410_v3 }
 0x241   :  { %v1760_v9 = vpop.eup %1759  ;;  %v965_v60 = vmul.f32 1.442695, %v942_v4  ;;  %v1063_v11 = vadd.f32 %v1758_v44, %v1062_v5 }
 0x242   :  { %v1762_v13 = vpop.eup %1761  ;;  %v989_v14 = vadd.f32 1.0, %v1760_v9 }
 0x243   :  { %1763 = vpow2.f32 %v965_v60  ;;  %v1075_v56 = vmul.f32 %v1762_v13, %v988_v59  ;;  %v1067_v16 = vsel %vm1066_vm7, %v1758_v44, %v1063_v11  ;;  %vm1080_vm10 = vweird.f32 %v1762_v13 }
 0x244   :  { %1765 = vrcp.f32 %v989_v14  ;;  %v911_v2 = vpop.f32.mrf.mxu3  ;;  %v1072_v23 = vsel %vm1069_vm8, %v1071_v18, %v1067_v16  ;;  %vm1081_vm13 = vmor %vm1079_vm11, %vm1080_vm10  ;;  %v1100_v34 = vand.u32 2147483648, %v989_v14  ;;  %v1098_v51 = vand.u32 2147483647, %v989_v14 }
 0x245   :  { %v2419_v19 = vadd.f32 %v2356_v24, %v911_v2  ;;  %v1076_v22 = vsub.f32 1.0, %v1075_v56  ;;  %v2422_v26 = vmul.f32 %v1072_v23, %v2372_v6  ;;  %vm1094_vm1 = vweird.f32 %v989_v14 }
 0x246   :  { %v1101_v44 = vor.u32 1.1754944e-38, %v1100_v34  ;;  %vm1099_vm4 = vcmp.eq.f32.partialorder %v1098_v51, 8.507059e+37 }
 0x247   :  { %v943_v7 = vsub.f32 0.0, %v2419_v19  ;;  %v1077_v27 = vmul.f32 %v1762_v13, %v1076_v22  ;;  %1259 = vst.msk [vmem:[%s2627_s13 + $0x20] sm:$0xff] %vm187_vm0, %v2422_v26 }
 0x249   :  { %v1764_v32 = vpop.eup %1763  ;;  %v967_v33 = vmul.f32 1.442695, %v943_v7  ;;  %v1078_v35 = vadd.f32 %v1762_v13, %v1077_v27 }
 0x24a   :  { %v1766_v36 = vpop.eup %1765  ;;  %v990_v37 = vadd.f32 1.0, %v1764_v32 }
 0x24b   :  { %1767 = vpow2.f32 %v967_v33  ;;  %v1090_v6 = vmul.f32 %v1766_v36, %v989_v14  ;;  %v1082_v20 = vsel %vm1081_vm13, %v1762_v13, %v1078_v35  ;;  %vm1095_vm15 = vweird.f32 %v1766_v36 }
 0x24c   :  { %1769 = vrcp.f32 %v990_v37  ;;  %v914_v40 = vpop.f32.mrf.mxu3  ;;  %v1087_v28 = vsel %vm1084_vm14, %v1086_v38, %v1082_v20  ;;  %vm1096_vm2 = vmor %vm1094_vm1, %vm1095_vm15  ;;  %v1115_v4 = vand.u32 2147483648, %v990_v37  ;;  %v1113_v5 = vand.u32 2147483647, %v990_v37 }
 0x24d   :  { %v2431_v41 = vadd.f32 %v2356_v24, %v914_v40  ;;  %v1091_v42 = vsub.f32 1.0, %v1090_v6  ;;  %v2434_v43 = vmul.f32 %v1087_v28, %v2383_v12  ;;  %vm1109_vm7 = vweird.f32 %v990_v37 }
 0x24e   :  { %v1116_v14 = vor.u32 1.1754944e-38, %v1115_v4  ;;  %vm1114_vm10 = vcmp.eq.f32.partialorder %v1113_v5, 8.507059e+37 }
 0x24f   :  { %v944_v45 = vsub.f32 0.0, %v2431_v41  ;;  %v1092_v47 = vmul.f32 %v1766_v36, %v1091_v42  ;;  %1260 = vst.msk [vmem:[%s2627_s13 + $0x28] sm:$0xff] %vm187_vm0, %v2434_v43 }
 0x251   :  { %v1768_v52 = vpop.eup %1767  ;;  %v969_v53 = vmul.f32 1.442695, %v944_v45  ;;  %v1093_v39 = vadd.f32 %v1766_v36, %v1092_v47 }
 0x252   :  { %v1770_v54 = vpop.eup %1769  ;;  %v991_v57 = vadd.f32 1.0, %v1768_v52 }
 0x253   :  { %1771 = vpow2.f32 %v969_v53  ;;  %v1105_v12 = vmul.f32 %v1770_v54, %v990_v37  ;;  %v1097_v58 = vsel %vm1096_vm2, %v1766_v36, %v1093_v39  ;;  %vm1110_vm5 = vweird.f32 %v1770_v54 }
 0x254   :  { %1773 = vrcp.f32 %v991_v57  ;;  %v917_v59 = vpop.f32.mrf.mxu3  ;;  %v1102_v62 = vsel %vm1099_vm4, %v1101_v44, %v1097_v58  ;;  %vm1111_vm8 = vmor %vm1109_vm7, %vm1110_vm5  ;;  %v1130_v27 = vand.u32 2147483648, %v991_v57  ;;  %v1128_v29 = vand.u32 2147483647, %v991_v57 }
 0x255   :  { %v2443_v48 = vadd.f32 %v2356_v24, %v917_v59  ;;  %v1106_v61 = vsub.f32 1.0, %v1105_v12  ;;  %v2446_v63 = vmul.f32 %v1102_v62, %v2395_v46  ;;  %vm1124_vm13 = vweird.f32 %v991_v57 }
 0x256   :  { %v1131_v6 = vor.u32 1.1754944e-38, %v1130_v27  ;;  %vm1129_vm15 = vcmp.eq.f32.partialorder %v1128_v29, 8.507059e+37 }
 0x257   :  { %v945_v50 = vsub.f32 0.0, %v2443_v48  ;;  %v1107_v1 = vmul.f32 %v1770_v54, %v1106_v61  ;;  %1261 = vst.msk [vmem:[%s2627_s13 + $0x30] sm:$0xff] %vm187_vm0, %v2446_v63 }
 0x259   :  { %v1772_v55 = vpop.eup %1771  ;;  %v971_v8 = vmul.f32 1.442695, %v945_v50  ;;  %v1108_v9 = vadd.f32 %v1770_v54, %v1107_v1 }
 0x25a   :  { %v1774_v60 = vpop.eup %1773  ;;  %v992_v11 = vadd.f32 1.0, %v1772_v55 }
 0x25b   :  { %1775 = vpow2.f32 %v971_v8  ;;  %v1120_v46 = vmul.f32 %v1774_v60, %v991_v57  ;;  %v1112_v13 = vsel %vm1111_vm8, %v1770_v54, %v1108_v9  ;;  %vm1125_vm11 = vweird.f32 %v1774_v60 }
 0x25c   :  { %1777 = vrcp.f32 %v992_v11  ;;  %v920_v56 = vpop.f32.mrf.mxu3  ;;  %v1117_v2 = vsel %vm1114_vm10, %v1116_v14, %v1112_v13  ;;  %vm1126_vm14 = vmor %vm1124_vm13, %vm1125_vm11  ;;  %v1145_v34 = vand.u32 2147483648, %v992_v11  ;;  %v1143_v51 = vand.u32 2147483647, %v992_v11 }
 0x25d   :  { %v2455_v16 = vadd.f32 %v2356_v24, %v920_v56  ;;  %v1121_v18 = vsub.f32 1.0, %v1120_v46  ;;  %v2458_v22 = vmul.f32 %v1117_v2, %v2407_v0  ;;  %vm1139_vm2 = vweird.f32 %v992_v11 }
 0x25e   :  { %v1146_v58 = vor.u32 1.1754944e-38, %v1145_v34  ;;  %vm1144_vm5 = vcmp.eq.f32.partialorder %v1143_v51, 8.507059e+37 }
 0x25f   :  { %v946_v23 = vsub.f32 0.0, %v2455_v16  ;;  %v1122_v7 = vmul.f32 %v1774_v60, %v1121_v18  ;;  %1262 = vst.msk [vmem:[%s2627_s13 + $0x38] sm:$0xff] %vm187_vm0, %v2458_v22 }
 0x261   :  { %v1776_v30 = vpop.eup %1775  ;;  %v973_v32 = vmul.f32 1.442695, %v946_v23  ;;  %v1123_v33 = vadd.f32 %v1774_v60, %v1122_v7 }
 0x262   :  { %v1778_v35 = vpop.eup %1777  ;;  %v993_v36 = vadd.f32 1.0, %v1776_v30 }
 0x263   :  { %1779 = vpow2.f32 %v973_v32  ;;  %v1135_v0 = vmul.f32 %v1778_v35, %v992_v11  ;;  %v1127_v37 = vsel %vm1126_vm14, %v1774_v60, %v1123_v33  ;;  %vm1140_vm1 = vweird.f32 %v1778_v35 }
 0x264   :  { %1781 = vrcp.f32 %v993_v36  ;;  %v923_v20 = vpop.f32.mrf.mxu3  ;;  %v1132_v42 = vsel %vm1129_vm15, %v1131_v6, %v1127_v37  ;;  %vm1141_vm4 = vmor %vm1139_vm2, %vm1140_vm1  ;;  %v1160_v5 = vand.u32 2147483648, %v993_v36  ;;  %v1158_v55 = vand.u32 2147483647, %v993_v36 }
 0x265   :  { %v2467_v38 = vadd.f32 %v2356_v24, %v923_v20  ;;  %v1136_v40 = vsub.f32 1.0, %v1135_v0  ;;  %v2470_v28 = vmul.f32 %v1132_v42, %v2419_v19  ;;  %vm1154_vm8 = vweird.f32 %v993_v36 }
 0x266   :  { %v1161_v14 = vor.u32 1.1754944e-38, %v1160_v5  ;;  %vm1159_vm11 = vcmp.eq.f32.partialorder %v1158_v55, 8.507059e+37 }
 0x267   :  { %v947_v45 = vsub.f32 0.0, %v2467_v38  ;;  %v1137_v47 = vmul.f32 %v1778_v35, %v1136_v40  ;;  %1263 = vst.msk [vmem:[%s2627_s13 + $0x40] sm:$0xff] %vm187_vm0, %v2470_v28 }
 0x269   :  { %v1780_v52 = vpop.eup %1779  ;;  %v975_v53 = vmul.f32 1.442695, %v947_v45  ;;  %v1138_v39 = vadd.f32 %v1778_v35, %v1137_v47 }
 0x26a   :  { %v1782_v54 = vpop.eup %1781  ;;  %v994_v57 = vadd.f32 1.0, %v1780_v52 }
 0x26b   :  { %1783 = vpow2.f32 %v975_v53  ;;  %v1150_v19 = vmul.f32 %v1782_v54, %v993_v36  ;;  %v1142_v12 = vsel %vm1141_vm4, %v1778_v35, %v1138_v39  ;;  %vm1155_vm7 = vweird.f32 %v1782_v54 }
 0x26c   :  { %1785 = vrcp.f32 %v994_v57  ;;  %v926_v44 = vpop.f32.mrf.mxu3  ;;  %v1147_v62 = vsel %vm1144_vm5, %v1146_v58, %v1142_v12  ;;  %vm1156_vm10 = vmor %vm1154_vm8, %vm1155_vm7  ;;  %v1175_v30 = vand.u32 2147483648, %v994_v57  ;;  %v1173_v32 = vand.u32 2147483647, %v994_v57 }
 0x26d   :  { %v2479_v59 = vadd.f32 %v2356_v24, %v926_v44  ;;  %v1151_v61 = vsub.f32 1.0, %v1150_v19  ;;  %v2482_v50 = vmul.f32 %v1147_v62, %v2431_v41  ;;  %vm1169_vm14 = vweird.f32 %v994_v57 }
 0x26e   :  { %v1176_v20 = vor.u32 1.1754944e-38, %v1175_v30  ;;  %vm1174_vm1 = vcmp.eq.f32.partialorder %v1173_v32, 8.507059e+37 }
 0x26f   :  { %v948_v1 = vsub.f32 0.0, %v2479_v59  ;;  %v1152_v4 = vmul.f32 %v1782_v54, %v1151_v61  ;;  %1264 = vst.msk [vmem:[%s2627_s13 + $0x48] sm:$0xff] %vm187_vm0, %v2482_v50 }
 0x271   :  { %v1784_v8 = vpop.eup %1783  ;;  %v977_v9 = vmul.f32 1.442695, %v948_v1  ;;  %v1153_v60 = vadd.f32 %v1782_v54, %v1152_v4 }
 0x272   :  { %v1786_v11 = vpop.eup %1785  ;;  %v995_v46 = vadd.f32 1.0, %v1784_v8 }
 0x273   :  { %1787 = vpow2.f32 %v977_v9  ;;  %v1165_v41 = vmul.f32 %v1786_v11, %v994_v57  ;;  %v1157_v13 = vsel %vm1156_vm10, %v1782_v54, %v1153_v60  ;;  %vm1170_vm13 = vweird.f32 %v1786_v11 }
 0x274   :  { %1789 = vrcp.f32 %v995_v46  ;;  %v929_v56 = vpop.f32.mrf.mxu3  ;;  %v1162_v23 = vsel %vm1159_vm11, %v1161_v14, %v1157_v13  ;;  %vm1171_vm15 = vmor %vm1169_vm14, %vm1170_vm13  ;;  %v1190_v53 = vand.u32 2147483648, %v995_v46  ;;  %v1188_v39 = vand.u32 2147483647, %v995_v46 }
 0x275   :  { %v2491_v18 = vadd.f32 %v2356_v24, %v929_v56  ;;  %v1166_v2 = vsub.f32 1.0, %v1165_v41  ;;  %v2494_v7 = vmul.f32 %v1162_v23, %v2443_v48  ;;  %vm1184_vm4 = vweird.f32 %v995_v46 }
 0x276   :  { %v1191_v44 = vor.u32 1.1754944e-38, %v1190_v53  ;;  %vm1189_vm7 = vcmp.eq.f32.partialorder %v1188_v39, 8.507059e+37 }
 0x277   :  { %v949_v27 = vsub.f32 0.0, %v2491_v18  ;;  %v1167_v29 = vmul.f32 %v1786_v11, %v1166_v2  ;;  %1265 = vst.msk [vmem:[%s2627_s13 + $0x50] sm:$0xff] %vm187_vm0, %v2494_v7 }
 0x279   :  { %v1788_v33 = vpop.eup %1787  ;;  %v979_v35 = vmul.f32 1.442695, %v949_v27  ;;  %v1168_v36 = vadd.f32 %v1786_v11, %v1167_v29 }
 0x27a   :  { %v1790_v0 = vpop.eup %1789  ;;  %v996_v37 = vadd.f32 1.0, %v1788_v33 }
 0x27b   :  { %1791 = vpow2.f32 %v979_v35  ;;  %v1180_v48 = vmul.f32 %v1790_v0, %v995_v46  ;;  %v1172_v6 = vsel %vm1171_vm15, %v1786_v11, %v1168_v36  ;;  %vm1185_vm2 = vweird.f32 %v1790_v0 }
 0x27c   :  { %1793 = vrcp.f32 %v996_v37  ;;  %v932_v40 = vpop.f32.mrf.mxu3  ;;  %v1177_v47 = vsel %vm1174_vm1, %v1176_v20, %v1172_v6  ;;  %vm1186_vm5 = vmor %vm1184_vm4, %vm1185_vm2  ;;  %v1205_v5 = vand.u32 2147483648, %v996_v37  ;;  %v1203_v55 = vand.u32 2147483647, %v996_v37 }
 0x27d   :  { %v2503_v42 = vadd.f32 %v2356_v24, %v932_v40  ;;  %v1181_v45 = vsub.f32 1.0, %v1180_v48  ;;  %v2506_v34 = vmul.f32 %v1177_v47, %v2455_v16  ;;  %vm1199_vm10 = vweird.f32 %v996_v37 }
 0x27e   :  { %v1206_v13 = vor.u32 1.1754944e-38, %v1205_v5  ;;  %vm1204_vm13 = vcmp.eq.f32.partialorder %v1203_v55, 8.507059e+37  ;;  %v1508_v55 = vld [vmem:[#allocation18 + $0x18] sm:$0xff] }
 0x27f   :  { %v950_v51 = vsub.f32 0.0, %v2503_v42  ;;  %v1182_v52 = vmul.f32 %v1790_v0, %v1181_v45  ;;  %1266 = vst.msk [vmem:[%s2627_s13 + $0x58] sm:$0xff] %vm187_vm0, %v2506_v34 }
 0x281   :  { %v1792_v54 = vpop.eup %1791  ;;  %v981_v24 = vmul.f32 1.442695, %v950_v51  ;;  %v1183_v57 = vadd.f32 %v1790_v0, %v1182_v52 }
 0x282   :  { %v1794_v19 = vpop.eup %1793  ;;  %v997_v12 = vadd.f32 1.0, %v1792_v54  ;;  %v1273_v54 = vld [vmem:[#allocation2 + $0x10] sm:$0xff] }
 0x283   :  { %1795 = vpow2.f32 %v981_v24  ;;  %v1195_v16 = vmul.f32 %v1794_v19, %v996_v37  ;;  %v1187_v58 = vsel %vm1186_vm5, %v1790_v0, %v1183_v57  ;;  %vm1200_vm8 = vweird.f32 %v1794_v19 }
 0x284   :  { %1797 = vrcp.f32 %v997_v12  ;;  %v1192_v62 = vsel %vm1189_vm7, %v1191_v44, %v1187_v58  ;;  %vm1201_vm11 = vmor %vm1199_vm10, %vm1200_vm8  ;;  %v1220_v56 = vand.u32 2147483648, %v997_v12  ;;  %v1218_v27 = vand.u32 2147483647, %v997_v12 }
 0x285   :  { %v1196_v61 = vsub.f32 1.0, %v1195_v16  ;;  %v1251_v1 = vmul.f32 %v1192_v62, %v2467_v38  ;;  %vm1214_vm15 = vweird.f32 %v997_v12  ;;  %v1274_v16 = vld [vmem:[#allocation2 + $0x18] sm:$0xff] }
 0x286   :  { %v1221_v32 = vor.u32 1.1754944e-38, %v1220_v56  ;;  %vm1219_vm2 = vcmp.eq.f32.partialorder %v1218_v27, 8.507059e+37 }
 0x287   :  { %v1197_v4 = vmul.f32 %v1794_v19, %v1196_v61  ;;  %1267 = vst.msk [vmem:[%s2627_s13 + $0x60] sm:$0xff] %vm187_vm0, %v1251_v1 }
 0x289   :  { %v1796_v8 = vpop.eup %1795  ;;  %v1198_v9 = vadd.f32 %v1794_v19, %v1197_v4 }
 0x28a   :  { %v1798_v60 = vpop.eup %1797  ;;  %v998_v11 = vadd.f32 1.0, %v1796_v8  ;;  %v1671_v8 = vld [vmem:[%s2624_s10] ss:$0 sm:$0xff] }
 0x28b   :  { %v1210_v46 = vmul.f32 %v1798_v60, %v997_v12  ;;  %v1202_v41 = vsel %vm1201_vm11, %v1794_v19, %v1198_v9  ;;  %vm1215_vm14 = vweird.f32 %v1798_v60 }
 0x28c   :  { %1799 = vrcp.f32 %v998_v11  ;;  %v1207_v14 = vsel %vm1204_vm13, %v1206_v13, %v1202_v41  ;;  %vm1216_vm1 = vmor %vm1214_vm15, %vm1215_vm14  ;;  %v1235_v37 = vand.u32 2147483648, %v998_v11  ;;  %v1233_v6 = vand.u32 2147483647, %v998_v11  ;;  %v1506_v41 = vld [vmem:[#allocation18 + $0x8] sm:$0xff] }
 0x28d   :  { %v1211_v38 = vsub.f32 1.0, %v1210_v46  ;;  %v1252_v2 = vmul.f32 %v1207_v14, %v2479_v59  ;;  %vm1229_vm5 = vweird.f32 %v998_v11 }
 0x28e   :  { %v1236_v40 = vor.u32 1.1754944e-38, %v1235_v37  ;;  %vm1234_vm8 = vcmp.eq.f32.partialorder %v1233_v6, 8.507059e+37 }
 0x28f   :  { %v1212_v23 = vmul.f32 %v1798_v60, %v1211_v38  ;;  %1268 = vst.msk [vmem:[%s2627_s13 + $0x68] sm:$0xff] %vm187_vm0, %v1252_v2  ;;  %v1505_v38 = vld [vmem:[#allocation18] sm:$0xff] }
 0x291   :  { %v1213_v29 = vadd.f32 %v1798_v60, %v1212_v23 }
 0x292   :  { %v1800_v30 = vpop.eup %1799 }
 0x293   :  { %v1225_v33 = vmul.f32 %v1800_v30, %v998_v11  ;;  %v1217_v35 = vsel %vm1216_vm1, %v1798_v60, %v1213_v29  ;;  %vm1230_vm4 = vweird.f32 %v1800_v30  ;;  %v1507_v60 = vld [vmem:[#allocation18 + $0x10] sm:$0xff] }
 0x294   :  { %v1222_v36 = vsel %vm1219_vm2, %v1221_v32, %v1217_v35  ;;  %vm1231_vm7 = vmor %vm1229_vm5, %vm1230_vm4 }
 0x295   :  { %v1226_v0 = vsub.f32 1.0, %v1225_v33  ;;  %v1253_v59 = vmul.f32 %v1222_v36, %v2491_v18  ;;  %v1334_v18 = vld [vmem:[#allocation16 + $0x18] sm:$0xff] }
 0x296   :  { %1359 = vmatpush.msrb.mxu1 %v1334_v18 }
 0x297   :  { %v1227_v48 = vmul.f32 %v1800_v30, %v1226_v0  ;;  %1269 = vst.msk [vmem:[%s2627_s13 + $0x70] sm:$0xff] %vm187_vm0, %v1253_v59 }
 0x299   :  { %v1228_v20 = vadd.f32 %v1800_v30, %v1227_v48 }
 0x29b   :  { %v1232_v45 = vsel %vm1231_vm7, %v1800_v30, %v1228_v20 }
 0x29c   :  { %v1237_v47 = vsel %vm1234_vm8, %v1236_v40, %v1232_v45 }
 0x29d   :  { %v1254_v51 = vmul.f32 %v1237_v47, %v2503_v42  ;;  %v1333_v42 = vld [vmem:[#allocation16 + $0x10] sm:$0xff] }
 0x29e   :  { %1360 = vmatpush.msrb.mxu1 %v1333_v42 }
 0x29f   :  { %1270 = vst.msk [vmem:[%s2627_s13 + $0x78] sm:$0xff] %vm187_vm0, %v1254_v51  ;;  %1275 = vmatpush.msrb.mxu0 %v1254_v51 }
 0x2a1   :  { %1276 = vmatpush.msrb.mxu0 %v1253_v59 }
 0x2a3   :  { %1277 = vmatpush.msrb.mxu0 %v1252_v2 }
 0x2a5   :  { %1278 = vmatpush.msrb.mxu0 %v1251_v1 }
 0x2a7   :  { %1279 = vmatpush.msrb.mxu0 %v2506_v34  ;;  %v1332_v34 = vld [vmem:[#allocation16 + $0x8] sm:$0xff] }
 0x2a8   :  { %1361 = vmatpush.msrb.mxu1 %v1332_v34 }
 0x2a9   :  { %1280 = vmatpush.msrb.mxu0 %v2494_v7 }
 0x2ab   :  { %1281 = vmatpush.msrb.mxu0 %v2482_v50  ;;  %v1272_v50 = vld [vmem:[#allocation2 + $0x8] sm:$0xff] }
 0x2ad   :  { %1282 = vmatpush.msrb.mxu0 %v2470_v28  ;;  %v1330_v28 = vld [vmem:[#allocation15 + $0x18] sm:$0xff] }
 0x2af   :  { %1283 = vmatpush.msrb.mxu0 %v2458_v22  ;;  %v2567_v22 = vld [vmem:[#allocation9 + $0x18] sm:$0xff] }
 0x2b1   :  { %1284 = vmatpush.msrb.mxu0 %v2446_v63  ;;  %v2081_v63 = vmov 1.0  }
 0x2b3   :  { %1285 = vmatpush.msrb.mxu0 %v2434_v43  ;;  %v1328_v43 = vld [vmem:[#allocation15 + $0x8] sm:$0xff] }
 0x2b5   :  { %1286 = vmatpush.msrb.mxu0 %v2422_v26  ;;  %v1329_v26 = vld [vmem:[#allocation15 + $0x10] sm:$0xff] }
 0x2b7   :  { %1287 = vmatpush.msrb.mxu0 %v2410_v3 }
 0x2b9   :  { %1288 = vmatpush.msrb.mxu0 %v2398_v49  ;;  %v2558_v49 = vld [vmem:[#allocation9 + $0x8] sm:$0xff] }
 0x2bb   :  { %1289 = vmatpush.msrb.mxu0 %v2386_v31  ;;  %v1331_v31 = vld [vmem:[#allocation16] sm:$0xff] }
 0x2bc   :  { %1362 = vmatpush.msrb.mxu1 %v1331_v31 }
 0x2bd   :  { %1290 = vmatpush.msrb.mxu0 %v2374_v10  ;;  %v1327_v10 = vld [vmem:[#allocation15] sm:$0xff] }
 0x2be   :  { %1637 = vmatmul.msk.f32.vlgmr.msrb.gmra.mxu0 %vm2214_vm3, %v2081_v63  ;;  %1537 = vmatpush.msra.mxu1 %v1508_v55 }
 0x2bf   :  { %1400 = vmatpush.msra.mxu0 %v1330_v28 }
 0x2c0   :  { %1538 = vmatpush.msra.mxu1 %v1507_v60 }
 0x2c1   :  { %1401 = vmatpush.msra.mxu0 %v1329_v26 }
 0x2c2   :  { %1539 = vmatpush.msra.mxu1 %v1506_v41 }
 0x2c3   :  { %1402 = vmatpush.msra.mxu0 %v1328_v43 }
 0x2c4   :  { %1540 = vmatpush.msra.mxu1 %v1505_v38 }
 0x2c5   :  { %1403 = vmatpush.msra.mxu0 %v1327_v10 }
 0x2c6   :  { %1638 = vmatmul.msk.f32.gmra.mxu0 %vm2223_vm6, %v2081_v63 }
 0x2ce   :  { %1639 = vmatmul.msk.f32.gmra.mxu0 %vm2232_vm9, %v2081_v63 }
 0x2d6   :  { %1640 = vmatmul.msk.f32.gmra.mxu0 %vm2241_vm12, %v2081_v63 }
 0x2de   :  { %1645 = vmatmul.msk.f32.vlgmr.msra.gmra.mxu0 %vm187_vm0, %v2554_v15 }
 0x2e6   :  { %1646 = vmatmul.msk.f32.gmra.mxu0 %vm187_vm0, %v2558_v49 }
 0x2ee   :  { %1647 = vmatmul.msk.f32.gmra.mxu0 %vm187_vm0, %v2562_v17 }
 0x2f6   :  { %1648 = vmatmul.msk.f32.gmra.mxu0 %vm187_vm0, %v2567_v22 }
 0x33b   :  { %v1292_v25 = vpop.f32.mrf.mxu0 }
 0x33c   :  { %v1304_v3 = vadd.f32 %v1292_v25, %v1271_v21 }
 0x33e   :  { %1308 = vst.msk [vmem:[#allocation2] sm:$0xff] %vm187_vm0, %v1304_v3 }
 0x343   :  { %v1295_v7 = vpop.f32.mrf.mxu0 }
 0x344   :  { %v1305_v52 = vadd.f32 %v1295_v7, %v1272_v50 }
 0x345   :  { %v1315_v53 = vld [vmem:[#allocation2] sm:$0xff] }
 0x346   :  { %1309 = vst.msk [vmem:[#allocation2 + $0x8] sm:$0xff] %vm187_vm0, %v1305_v52  ;;  %v1319_v39 = vmul.f32 0.125, %v1315_v53 }
 0x348   :  { %1641 = vmatmul.msk.f32.vlgmr.msrb.gmra.mxu1 %vm187_vm0, %v1319_v39 }
 0x34b   :  { %v1298_v24 = vpop.f32.mrf.mxu0 }
 0x34c   :  { %v1306_v57 = vadd.f32 %v1298_v24, %v1273_v54 }
 0x34d   :  { %v1316_v19 = vld [vmem:[#allocation2 + $0x8] sm:$0xff] }
 0x34e   :  { %1310 = vst.msk [vmem:[#allocation2 + $0x10] sm:$0xff] %vm187_vm0, %v1306_v57  ;;  %v1320_v12 = vmul.f32 0.125, %v1316_v19 }
 0x350   :  { %1642 = vmatmul.msk.f32.gmra.mxu1 %vm187_vm0, %v1320_v12 }
 0x353   :  { %v1301_v58 = vpop.f32.mrf.mxu0 }
 0x354   :  { %v1307_v44 = vadd.f32 %v1301_v58, %v1274_v16 }
 0x355   :  { %v1317_v61 = vld [vmem:[#allocation2 + $0x10] sm:$0xff] }
 0x356   :  { %1311 = vst.msk [vmem:[#allocation2 + $0x18] sm:$0xff] %vm187_vm0, %v1307_v44  ;;  %v1321_v62 = vmul.f32 0.125, %v1317_v61 }
 0x358   :  { %1643 = vmatmul.msk.f32.gmra.mxu1 %vm187_vm0, %v1321_v62 }
 0x35b   :  { %v1405_v5 = vpop.f32.mrf.mxu0 }
 0x35d   :  { %v1318_v1 = vld [vmem:[#allocation2 + $0x18] sm:$0xff] }
 0x35e   :  { %v1322_v4 = vmul.f32 0.125, %v1318_v1 }
 0x360   :  { %1644 = vmatmul.msk.f32.gmra.mxu1 %vm187_vm0, %v1322_v4 }
 0x363   :  { %v1408_v46 = vpop.f32.mrf.mxu0 }
 0x36b   :  { %v1411_v29 = vpop.f32.mrf.mxu0 }
 0x373   :  { %v1414_v48 = vpop.f32.mrf.mxu0 }
 0x3c5   :  { %v1364_v9 = vpop.f32.mrf.mxu1 }
 0x3c6   :  { %v1406_v11 = vadd.f32 %v1405_v5, %v1364_v9 }
 0x3c8   :  { %v1421_v13 = vadd.f32 %v1671_v8, %v1406_v11 }
 0x3ca   :  { %v1425_v14 = vsub.f32 0.0, %v1421_v13 }
 0x3cc   :  { %v1429_v56 = vmul.f32 1.442695, %v1425_v14 }
 0x3cd   :  { %v1367_v2 = vpop.f32.mrf.mxu1 }
 0x3ce   :  { %1801 = vpow2.f32 %v1429_v56  ;;  %v1409_v23 = vadd.f32 %v1408_v46, %v1367_v2 }
 0x3d0   :  { %v2581_v27 = vadd.f32 %v1671_v8, %v1409_v23 }
 0x3d2   :  { %v1426_v30 = vsub.f32 0.0, %v2581_v27 }
 0x3d4   :  { %v1802_v32 = vpop.eup %1801  ;;  %v1431_v33 = vmul.f32 1.442695, %v1426_v30 }
 0x3d5   :  { %v1437_v35 = vadd.f32 1.0, %v1802_v32  ;;  %v1370_v36 = vpop.f32.mrf.mxu1 }
 0x3d6   :  { %1803 = vpow2.f32 %v1431_v33  ;;  %v1412_v0 = vadd.f32 %v1411_v29, %v1370_v36 }
 0x3d7   :  { %1805 = vrcp.f32 %v1437_v35  ;;  %v1452_v28 = vand.u32 2147483648, %v1437_v35  ;;  %v1450_v26 = vand.u32 2147483647, %v1437_v35  ;;  %vm1446_vm6 = vweird.f32 %v1437_v35 }
 0x3d8   :  { %v2584_v59 = vadd.f32 %v1671_v8, %v1412_v0  ;;  %v1672_v0 = vld [vmem:[%s2626_s12] ss:$0 sm:$0xff]  ;;  %s2082_s12 = smov [#allocation19]  }
 0x3d9   :  { %v1453_v3 = vor.u32 1.1754944e-38, %v1452_v28  ;;  %vm1451_vm12 = vcmp.eq.f32.partialorder %v1450_v26, 8.507059e+37  ;;  %s1568_s28 = sshll.u32 %s2082_s12, 4  ;;  %s1569_s28 = int_to_ptr.vmem [resolvable:$true] %s1568_s28 }
 0x3da   :  { %v1427_v37 = vsub.f32 0.0, %v2584_v59 }
 0x3dc   :  { %v1804_v6 = vpop.eup %1803  ;;  %v1433_v20 = vmul.f32 1.442695, %v1427_v37 }
 0x3dd   :  { %v1806_v40 = vpop.eup %1805  ;;  %v1438_v45 = vadd.f32 1.0, %v1804_v6  ;;  %v1373_v47 = vpop.f32.mrf.mxu1 }
 0x3de   :  { %v1442_v51 = vmul.f32 %v1806_v40, %v1437_v35  ;;  %1807 = vpow2.f32 %v1433_v20  ;;  %v1415_v18 = vadd.f32 %v1414_v48, %v1373_v47  ;;  %vm1447_vm3 = vweird.f32 %v1806_v40 }
 0x3df   :  { %1809 = vrcp.f32 %v1438_v45  ;;  %vm1448_vm9 = vmor %vm1446_vm6, %vm1447_vm3  ;;  %v1467_v24 = vand.u32 2147483648, %v1438_v45  ;;  %v1465_v19 = vand.u32 2147483647, %v1438_v45  ;;  %vm1461_vm11 = vweird.f32 %v1438_v45 }
 0x3e0   :  { %v1443_v42 = vsub.f32 1.0, %v1442_v51  ;;  %v2587_v34 = vadd.f32 %v1671_v8, %v1415_v18 }
 0x3e1   :  { %v1468_v61 = vor.u32 1.1754944e-38, %v1467_v24  ;;  %vm1466_vm14 = vcmp.eq.f32.partialorder %v1465_v19, 8.507059e+37 }
 0x3e2   :  { %v1444_v63 = vmul.f32 %v1806_v40, %v1443_v42  ;;  %v1428_v43 = vsub.f32 0.0, %v2587_v34 }
 0x3e4   :  { %v1808_v31 = vpop.eup %1807  ;;  %v1445_v10 = vadd.f32 %v1806_v40, %v1444_v63  ;;  %v1435_v21 = vmul.f32 1.442695, %v1428_v43 }
 0x3e5   :  { %v1810_v25 = vpop.eup %1809  ;;  %v1439_v50 = vadd.f32 1.0, %v1808_v31 }
 0x3e6   :  { %v1449_v7 = vsel %vm1448_vm9, %v1806_v40, %v1445_v10  ;;  %1811 = vpow2.f32 %v1435_v21  ;;  %v1457_v52 = vmul.f32 %v1810_v25, %v1438_v45  ;;  %vm1462_vm10 = vweird.f32 %v1810_v25 }
 0x3e7   :  { %v1454_v53 = vsel %vm1451_vm12, %v1453_v3, %v1449_v7  ;;  %1813 = vrcp.f32 %v1439_v50  ;;  %vm1463_vm13 = vmor %vm1461_vm11, %vm1462_vm10  ;;  %v1482_v8 = vand.u32 2147483648, %v1439_v50  ;;  %v1480_v60 = vand.u32 2147483647, %v1439_v50 }
 0x3e8   :  { %v1501_v39 = vmul.f32 %v1454_v53, %v1421_v13  ;;  %v1458_v54 = vsub.f32 1.0, %v1457_v52  ;;  %vm1476_vm1 = vweird.f32 %v1439_v50 }
 0x3e9   :  { %v1483_v41 = vor.u32 1.1754944e-38, %v1482_v8  ;;  %vm1481_vm4 = vcmp.eq.f32.partialorder %v1480_v60, 8.507059e+37 }
 0x3ea   :  { %1649 = vmatmul.msk.f32.vlgmr.msra.gmra.mxu1 %vm187_vm0, %v1501_v39  ;;  %v1459_v57 = vmul.f32 %v1810_v25, %v1458_v54 }
 0x3ec   :  { %v1812_v12 = vpop.eup %1811  ;;  %v1460_v16 = vadd.f32 %v1810_v25, %v1459_v57 }
 0x3ed   :  { %v1814_v58 = vpop.eup %1813  ;;  %v1440_v44 = vadd.f32 1.0, %v1812_v12 }
 0x3ee   :  { %v1464_v62 = vsel %vm1463_vm13, %v1810_v25, %v1460_v16  ;;  %v1472_v1 = vmul.f32 %v1814_v58, %v1439_v50  ;;  %vm1477_vm15 = vweird.f32 %v1814_v58 }
 0x3ef   :  { %1815 = vrcp.f32 %v1440_v44  ;;  %v1469_v4 = vsel %vm1466_vm14, %v1468_v61, %v1464_v62  ;;  %vm1478_vm2 = vmor %vm1476_vm1, %vm1477_vm15  ;;  %v1497_v23 = vand.u32 2147483648, %v1440_v44  ;;  %v1495_v29 = vand.u32 2147483647, %v1440_v44 }
 0x3f0   :  { %v1502_v5 = vmul.f32 %v1469_v4, %v2581_v27  ;;  %v1473_v55 = vsub.f32 1.0, %v1472_v1  ;;  %vm1491_vm7 = vweird.f32 %v1440_v44 }
 0x3f1   :  { %v1498_v32 = vor.u32 1.1754944e-38, %v1497_v23  ;;  %vm1496_vm3 = vcmp.eq.f32.partialorder %v1495_v29, 8.507059e+37 }
 0x3f2   :  { %1650 = vmatmul.msk.f32.gmra.mxu1 %vm187_vm0, %v1502_v5  ;;  %v1474_v9 = vmul.f32 %v1814_v58, %v1473_v55 }
 0x3f4   :  { %v1475_v11 = vadd.f32 %v1814_v58, %v1474_v9 }
 0x3f5   :  { %v1816_v46 = vpop.eup %1815 }
 0x3f6   :  { %v1479_v13 = vsel %vm1478_vm2, %v1814_v58, %v1475_v11  ;;  %v1487_v38 = vmul.f32 %v1816_v46, %v1440_v44  ;;  %vm1492_vm5 = vweird.f32 %v1816_v46 }
 0x3f7   :  { %v1484_v14 = vsel %vm1481_vm4, %v1483_v41, %v1479_v13  ;;  %vm1493_vm8 = vmor %vm1491_vm7, %vm1492_vm5 }
 0x3f8   :  { %v1503_v56 = vmul.f32 %v1484_v14, %v2584_v59  ;;  %v1488_v2 = vsub.f32 1.0, %v1487_v38 }
 0x3fa   :  { %1651 = vmatmul.msk.f32.gmra.mxu1 %vm187_vm0, %v1503_v56  ;;  %v1489_v27 = vmul.f32 %v1816_v46, %v1488_v2 }
 0x3fc   :  { %v1490_v30 = vadd.f32 %v1816_v46, %v1489_v27 }
 0x3fe   :  { %v1494_v33 = vsel %vm1493_vm8, %v1816_v46, %v1490_v30 }
 0x3ff   :  { %v1499_v35 = vsel %vm1496_vm3, %v1498_v32, %v1494_v33 }
 0x400   :  { %v1504_v36 = vmul.f32 %v1499_v35, %v2587_v34 }
 0x402   :  { %1652 = vmatmul.msk.f32.gmra.mxu1 %vm187_vm0, %v1504_v36 }
 0x467   :  { %v1542_v59 = vpop.f32.mrf.mxu1 }
 0x468   :  { %v1543_v37 = vadd.f32 %v1672_v0, %v1542_v59 }
 0x46a   :  { %v1554_v48 = vadd.f32 %v1543_v37, %v2554_v15 }
 0x46c   :  { %1558 = vst.msk [vmem:[#allocation19] sm:$0xff] %vm187_vm0, %v1554_v48 }
 0x46f   :  { %v1545_v6 = vpop.f32.mrf.mxu1 }
 0x470   :  { %v1546_v20 = vadd.f32 %v1672_v0, %v1545_v6 }
 0x472   :  { %v1555_v40 = vadd.f32 %v1546_v20, %v2558_v49 }
 0x474   :  { %1559 = vst.msk [vmem:[#allocation19 + $0x8] sm:$0xff] %vm187_vm0, %v1555_v40 }
 0x477   :  { %v1548_v45 = vpop.f32.mrf.mxu1 }
 0x478   :  { %v1549_v47 = vadd.f32 %v1672_v0, %v1548_v45 }
 0x47a   :  { %v1556_v51 = vadd.f32 %v1549_v47, %v2562_v17 }
 0x47c   :  { %1560 = vst.msk [vmem:[#allocation19 + $0x10] sm:$0xff] %vm187_vm0, %v1556_v51 }
 0x47f   :  { %v1551_v18 = vpop.f32.mrf.mxu1 }
 0x480   :  { %v1552_v15 = vadd.f32 %v1672_v0, %v1551_v18 }
 0x482   :  { %v1557_v42 = vadd.f32 %v1552_v15, %v2567_v22 }
 0x484   :  { %1561 = vst.msk [vmem:[#allocation19 + $0x18] sm:$0xff] %vm187_vm0, %v1557_v42 }
 0x485   :  { %1576 = dma.vmem_to_hbm [thread:$0]  %s1569_s28, 512, %s1571_s3, [#allocation6], %s2071_s1, %s2071_s1, %s2072_s26  }
 0x486   :  { %2067 = dma.done.wait [#allocation6], 512  }
 0x487   :  { %2068 = vsyncadd [#allocation6], 4294966784 }
 0x488   :  { %1583 = vsyncpa [#allocation5], 1 }
 0x489   :  { %1584 = vsyncpa [#allocation8], 1 }
 0x48a   :  { %1585 = vsyncpa [#allocation11], 1 }
 0x48b   :  { %1586 = vsyncpa [#allocation14], 1 }
 0x48c   :  { %1587 = vsyncpa [#allocation17], 1 }
 0x48d   :  { %1588 = vsyncpa [#allocation6], 1 }

</bundles_post_ra>
